<compile_context>
chip_gen: v6e
topology: v6e:2x2x1
jax: 0.10.0
libtpu: 0.0.40
codegen_flags: <defaults>
</compile_context>

<pallas_src>
import math

import jax
import jax.numpy as jnp
from jax.experimental import pallas as pl
from jax.experimental.pallas import tpu as pltpu


# --------------------------------------------------------------- fused kernel
def rnn_fused_kernel(x_ref, w_ih0_ref, w_hh0_ref, b0_ref,
                     w_l1_ref, b1_ref, w_out_ref, b_out_ref,
                     out_ref,
                     pre0_scr, h0_scr, c0_scr, h1_scr, c1_scr):
    """Fused 2-layer LSTM + linear + softmax.

    x_ref    : (T, Bp, D)   time-major embedded inputs
    w_ih0    : (D, 4H)      layer-0 input->gates (gate order i, f, g, o)
    w_hh0    : (H, 4H)      layer-0 hidden->gates
    b0       : (1, 4H)      layer-0 combined bias (b_ih + b_hh)
    w_l1     : (2H, 4H)     layer-1 stacked [W_ih1; W_hh1]
    b1       : (1, 4H)      layer-1 combined bias
    w_out    : (H, 2)       output linear weight
    b_out    : (1, 2)       output linear bias
    out_ref  : (Bp, 2)      softmax probabilities
    pre0_scr : (T, Bp, 4H)  hoisted layer-0 input projection
    h*/c*    : (Bp, H)      recurrent state scratch
    """
    T, Bp, D = x_ref.shape
    H = h0_scr.shape[-1]

    # ---- hoisted layer-0 input projection: one MXU-friendly matmul ----------
    x_flat = x_ref[...].reshape(T * Bp, D)
    pre0 = jnp.dot(x_flat, w_ih0_ref[...],
                   preferred_element_type=jnp.float32) + b0_ref[...]
    pre0_scr[...] = pre0.reshape(T, Bp, 4 * H)

    h0_scr[...] = jnp.zeros_like(h0_scr)
    c0_scr[...] = jnp.zeros_like(c0_scr)
    h1_scr[...] = jnp.zeros_like(h1_scr)
    c1_scr[...] = jnp.zeros_like(c1_scr)

    w_hh0 = w_hh0_ref[...]
    w_l1 = w_l1_ref[...]
    b1 = b1_ref[...]

    def lstm_update(gates, c_prev):
        # NOTE: sub-128-lane slices at H=32; becomes free when H % 128 == 0.
        i_g = jax.nn.sigmoid(gates[:, 0 * H:1 * H])
        f_g = jax.nn.sigmoid(gates[:, 1 * H:2 * H])
        g_g = jnp.tanh(gates[:, 2 * H:3 * H])
        o_g = jax.nn.sigmoid(gates[:, 3 * H:4 * H])
        c_new = f_g * c_prev + i_g * g_g
        h_new = o_g * jnp.tanh(c_new)
        return h_new, c_new

    def step(t, carry):
        # Layer 0: only the serial recurrent dot remains on the critical path.
        gates0 = pre0_scr[t] + jnp.dot(h0_scr[...], w_hh0,
                                       preferred_element_type=jnp.float32)
        h0_new, c0_new = lstm_update(gates0, c0_scr[...])
        h0_scr[...] = h0_new
        c0_scr[...] = c0_new

        # Layer 1: single fused dot [x_t(=h0_new), h1_prev] @ [W_ih1; W_hh1].
        xin = jnp.concatenate([h0_new, h1_scr[...]], axis=-1)   # (Bp, 2H)
        gates1 = jnp.dot(xin, w_l1,
                         preferred_element_type=jnp.float32) + b1
        h1_new, c1_new = lstm_update(gates1, c1_scr[...])
        h1_scr[...] = h1_new
        c1_scr[...] = c1_new
        return carry

    # T is short and fixed -> full unroll for LLO scheduling visibility.
    jax.lax.fori_loop(0, T, step, 0, unroll=True)

    # ---- head: rec_out = h_n[-1]; dropout(p=0) is identity ------------------
    logits = jnp.dot(h1_scr[...], w_out_ref[...],
                     preferred_element_type=jnp.float32) + b_out_ref[...]
    m = jnp.max(logits, axis=-1, keepdims=True)
    e = jnp.exp(logits - m)
    denom = jnp.sum(e, axis=-1, keepdims=True)
    out_ref[...] = e * pl.reciprocal(denom, approx=True)


def rnn_fused(x_tbd, w_ih0, w_hh0, b0, w_l1, b1, w_out, b_out):
    T, Bp, _ = x_tbd.shape
    H = w_hh0.shape[0]
    n_cls = w_out.shape[-1]
    vmem = pl.BlockSpec(memory_space=pltpu.MemorySpace.VMEM)
    return pl.pallas_call(
        rnn_fused_kernel,
        out_shape=jax.ShapeDtypeStruct((Bp, n_cls), jnp.float32),
        in_specs=[vmem] * 8,
        out_specs=vmem,
        scratch_shapes=[
            pltpu.VMEM((T, Bp, 4 * H), jnp.float32),   # hoisted pre-gates
            pltpu.VMEM((Bp, H), jnp.float32),          # h0
            pltpu.VMEM((Bp, H), jnp.float32),          # c0
            pltpu.VMEM((Bp, H), jnp.float32),          # h1
            pltpu.VMEM((Bp, H), jnp.float32),          # c1
        ],
    )(x_tbd, w_ih0, w_hh0, b0, w_l1, b1, w_out, b_out)


# ----------------------------------------------------------------- parameters
def init_params(key, vocab_size, embedding_dim, num_units, num_layers):
    n_keys = 1 + 4 * num_layers + 2
    keys = jax.random.split(key, n_keys)
    ki = iter(keys)
    params = {}
    # Embedding ~ N(0, 1), like nn.Embedding default.
    params["emb"] = jax.random.normal(
        next(ki), (vocab_size + 1, embedding_dim), jnp.float32)
    k = 1.0 / math.sqrt(num_units)
    layers = []
    for layer in range(num_layers):
        din = embedding_dim if layer == 0 else num_units
        w_ih = jax.random.uniform(next(ki), (din, 4 * num_units),
                                  jnp.float32, -k, k)
        w_hh = jax.random.uniform(next(ki), (num_units, 4 * num_units),
                                  jnp.float32, -k, k)
        b_ih = jax.random.uniform(next(ki), (1, 4 * num_units),
                                  jnp.float32, -k, k)
        b_hh = jax.random.uniform(next(ki), (1, 4 * num_units),
                                  jnp.float32, -k, k)
        layers.append((w_ih, w_hh, b_ih + b_hh))
    params["lstm"] = layers
    params["w_out"] = jax.random.uniform(next(ki), (num_units, 2),
                                         jnp.float32, -k, k)
    params["b_out"] = jax.random.uniform(next(ki), (1, 2),
                                         jnp.float32, -k, k)
    return params


# -------------------------------------------------------------------- forward
def rnn_classifier_forward(params, X):
    assert len(params["lstm"]) == 2, "fused kernel is specialized to 2 layers"
    B, _ = X.shape
    Bp = max(8, ((B + 7) // 8) * 8)        # pad batch to fp32 sublane multiple

    # Embedding lookup (gather) kept as plain-JAX glue; note jnp.take clamps
    # out-of-range token ids instead of erroring.
    emb = jnp.take(params["emb"], X, axis=0)      # (B, T, D)
    x = jnp.transpose(emb, (1, 0, 2))             # time-major (T, B, D)
    if Bp != B:
        x = jnp.pad(x, ((0, 0), (0, Bp - B), (0, 0)))

    (w_ih0, w_hh0, b0), (w_ih1, w_hh1, b1) = params["lstm"]
    w_l1 = jnp.concatenate([w_ih1, w_hh1], axis=0)    # (2H, 4H)

    probs = rnn_fused(x, w_ih0, w_hh0, b0, w_l1, b1,
                      params["w_out"], params["b_out"])   # (Bp, 2)
    return probs[:B]


if __name__ == "__main__":
    # Small, self-consistent shapes.
    B, T = 2, 8
    vocab_size = 50
    embedding_dim = 32
    num_units = 32
    num_layers = 2

    key = jax.random.PRNGKey(0)
    k_par, k_x = jax.random.split(key)
    params = init_params(k_par, vocab_size, embedding_dim, num_units, num_layers)
    X = jax.random.randint(k_x, (B, T), 0, vocab_size + 1, dtype=jnp.int32)

    out = jax.block_until_ready(rnn_classifier_forward(params, X))

    assert out.shape == (B, 2)
    # approx reciprocal in the softmax -> allow ~2^-12 relative slack.
    assert bool(jnp.allclose(jnp.sum(out, axis=-1), 1.0, atol=2e-3))
    print("KERNEL_OK")
</pallas_src>

<mosaic_0001>
module attributes {stable_mosaic.version = 11 : i64} {
  func.func @rnn_fused_kernel(%arg0: memref<8x8x32xf32, #tpu.memory_space<vmem>>, %arg1: memref<32x128xf32, #tpu.memory_space<vmem>>, %arg2: memref<32x128xf32, #tpu.memory_space<vmem>>, %arg3: memref<1x128xf32, #tpu.memory_space<vmem>>, %arg4: memref<64x128xf32, #tpu.memory_space<vmem>>, %arg5: memref<1x128xf32, #tpu.memory_space<vmem>>, %arg6: memref<32x2xf32, #tpu.memory_space<vmem>>, %arg7: memref<1x2xf32, #tpu.memory_space<vmem>>, %arg8: memref<8x2xf32, #tpu.memory_space<vmem>>, %arg9: memref<8x8x128xf32, #tpu.memory_space<vmem>>, %arg10: memref<8x32xf32, #tpu.memory_space<vmem>>, %arg11: memref<8x32xf32, #tpu.memory_space<vmem>>, %arg12: memref<8x32xf32, #tpu.memory_space<vmem>>, %arg13: memref<8x32xf32, #tpu.memory_space<vmem>>) attributes {dimension_semantics = [], scalar_prefetch = 0 : i64, scratch_operands = 5 : i64, tpu.core_type = #tpu.core_type<tc>} {
    %c0 = arith.constant 0 : index
    %c0_0 = arith.constant 0 : index
    %c0_1 = arith.constant 0 : index
    %0 = vector.load %arg0[%c0, %c0_0, %c0_1] : memref<8x8x32xf32, #tpu.memory_space<vmem>>, vector<8x8x32xf32>
    %1 = vector.shape_cast %0 : vector<8x8x32xf32> to vector<64x32xf32>
    %c0_2 = arith.constant 0 : index
    %c0_3 = arith.constant 0 : index
    %2 = vector.load %arg1[%c0_2, %c0_3] : memref<32x128xf32, #tpu.memory_space<vmem>>, vector<32x128xf32>
    %cst = arith.constant dense<0.000000e+00> : vector<64x128xf32>
    %3 = tpu.matmul %1, %2, %cst {dimension_numbers = #tpu.dot_dimension_numbers<[1], [0], [0], [1], [0, 0, 1, 1], [], []>} : vector<64x32xf32>, vector<32x128xf32>, vector<64x128xf32> -> vector<64x128xf32>
    %c0_4 = arith.constant 0 : index
    %c0_5 = arith.constant 0 : index
    %4 = vector.load %arg3[%c0_4, %c0_5] : memref<1x128xf32, #tpu.memory_space<vmem>>, vector<1x128xf32>
    %5 = vector.broadcast %4 : vector<1x128xf32> to vector<64x128xf32>
    %6 = arith.addf %3, %5 : vector<64x128xf32>
    %7 = vector.shape_cast %6 : vector<64x128xf32> to vector<8x8x128xf32>
    %c0_6 = arith.constant 0 : index
    %c0_7 = arith.constant 0 : index
    %c0_8 = arith.constant 0 : index
    %8 = vector.load %arg9[%c0_6, %c0_7, %c0_8] : memref<8x8x128xf32, #tpu.memory_space<vmem>>, vector<8x8x128xf32>
    tpu.vector_store %arg9[%c0_6, %c0_7, %c0_8], %7 {strides = array<i32>} : memref<8x8x128xf32, #tpu.memory_space<vmem>>, vector<8x8x128xf32>,
    %cst_9 = arith.constant 0.000000e+00 : f32
    %9 = vector.broadcast %cst_9 : f32 to vector<8x32xf32>
    %c0_10 = arith.constant 0 : index
    %c0_11 = arith.constant 0 : index
    %10 = vector.load %arg10[%c0_10, %c0_11] : memref<8x32xf32, #tpu.memory_space<vmem>>, vector<8x32xf32>
    tpu.vector_store %arg10[%c0_10, %c0_11], %9 {strides = array<i32>} : memref<8x32xf32, #tpu.memory_space<vmem>>, vector<8x32xf32>,
    %cst_12 = arith.constant 0.000000e+00 : f32
    %11 = vector.broadcast %cst_12 : f32 to vector<8x32xf32>
    %c0_13 = arith.constant 0 : index
    %c0_14 = arith.constant 0 : index
    %12 = vector.load %arg11[%c0_13, %c0_14] : memref<8x32xf32, #tpu.memory_space<vmem>>, vector<8x32xf32>
    tpu.vector_store %arg11[%c0_13, %c0_14], %11 {strides = array<i32>} : memref<8x32xf32, #tpu.memory_space<vmem>>, vector<8x32xf32>,
    %cst_15 = arith.constant 0.000000e+00 : f32
    %13 = vector.broadcast %cst_15 : f32 to vector<8x32xf32>
    %c0_16 = arith.constant 0 : index
    %c0_17 = arith.constant 0 : index
    %14 = vector.load %arg12[%c0_16, %c0_17] : memref<8x32xf32, #tpu.memory_space<vmem>>, vector<8x32xf32>
    tpu.vector_store %arg12[%c0_16, %c0_17], %13 {strides = array<i32>} : memref<8x32xf32, #tpu.memory_space<vmem>>, vector<8x32xf32>,
    %cst_18 = arith.constant 0.000000e+00 : f32
    %15 = vector.broadcast %cst_18 : f32 to vector<8x32xf32>
    %c0_19 = arith.constant 0 : index
    %c0_20 = arith.constant 0 : index
    %16 = vector.load %arg13[%c0_19, %c0_20] : memref<8x32xf32, #tpu.memory_space<vmem>>, vector<8x32xf32>
    tpu.vector_store %arg13[%c0_19, %c0_20], %15 {strides = array<i32>} : memref<8x32xf32, #tpu.memory_space<vmem>>, vector<8x32xf32>,
    %c0_21 = arith.constant 0 : index
    %c0_22 = arith.constant 0 : index
    %17 = vector.load %arg2[%c0_21, %c0_22] : memref<32x128xf32, #tpu.memory_space<vmem>>, vector<32x128xf32>
    %c0_23 = arith.constant 0 : index
    %c0_24 = arith.constant 0 : index
    %18 = vector.load %arg4[%c0_23, %c0_24] : memref<64x128xf32, #tpu.memory_space<vmem>>, vector<64x128xf32>
    %c0_25 = arith.constant 0 : index
    %c0_26 = arith.constant 0 : index
    %19 = vector.load %arg5[%c0_25, %c0_26] : memref<1x128xf32, #tpu.memory_space<vmem>>, vector<1x128xf32>
    %c0_i32 = arith.constant 0 : i32
    %20 = arith.index_cast %c0_i32 : i32 to index
    %c0_27 = arith.constant 0 : index
    %c0_28 = arith.constant 0 : index
    %21 = vector.load %arg9[%20, %c0_27, %c0_28] : memref<8x8x128xf32, #tpu.memory_space<vmem>>, vector<1x8x128xf32>
    %22 = vector.shape_cast %21 : vector<1x8x128xf32> to vector<8x128xf32>
    %c0_29 = arith.constant 0 : index
    %c0_30 = arith.constant 0 : index
    %23 = vector.load %arg10[%c0_29, %c0_30] : memref<8x32xf32, #tpu.memory_space<vmem>>, vector<8x32xf32>
    %cst_31 = arith.constant dense<0.000000e+00> : vector<8x128xf32>
    %24 = tpu.matmul %23, %17, %cst_31 {dimension_numbers = #tpu.dot_dimension_numbers<[1], [0], [0], [1], [0, 0, 1, 1], [], []>} : vector<8x32xf32>, vector<32x128xf32>, vector<8x128xf32> -> vector<8x128xf32>
    %25 = arith.addf %22, %24 : vector<8x128xf32>
    %c0_32 = arith.constant 0 : index
    %c0_33 = arith.constant 0 : index
    %26 = vector.load %arg11[%c0_32, %c0_33] : memref<8x32xf32, #tpu.memory_space<vmem>>, vector<8x32xf32>
    %27 = vector.extract_strided_slice %25 {offsets = [0, 0], sizes = [8, 32], strides = [1, 1]} : vector<8x128xf32> to vector<8x32xf32>
    %28 = arith.negf %27 : vector<8x32xf32>
    %29 = math.exp %28 : vector<8x32xf32>
    %cst_34 = arith.constant 1.000000e+00 : f32
    %30 = vector.broadcast %cst_34 : f32 to vector<8x32xf32>
    %31 = arith.addf %30, %29 : vector<8x32xf32>
    %32 = arith.divf %30, %31 : vector<8x32xf32>
    %33 = vector.extract_strided_slice %25 {offsets = [0, 32], sizes = [8, 32], strides = [1, 1]} : vector<8x128xf32> to vector<8x32xf32>
    %34 = arith.negf %33 : vector<8x32xf32>
    %35 = math.exp %34 : vector<8x32xf32>
    %cst_35 = arith.constant 1.000000e+00 : f32
    %36 = vector.broadcast %cst_35 : f32 to vector<8x32xf32>
    %37 = arith.addf %36, %35 : vector<8x32xf32>
    %38 = arith.divf %36, %37 : vector<8x32xf32>
    %39 = vector.extract_strided_slice %25 {offsets = [0, 64], sizes = [8, 32], strides = [1, 1]} : vector<8x128xf32> to vector<8x32xf32>
    %40 = math.tanh %39 : vector<8x32xf32>
    %41 = vector.extract_strided_slice %25 {offsets = [0, 96], sizes = [8, 32], strides = [1, 1]} : vector<8x128xf32> to vector<8x32xf32>
    %42 = arith.negf %41 : vector<8x32xf32>
    %43 = math.exp %42 : vector<8x32xf32>
    %cst_36 = arith.constant 1.000000e+00 : f32
    %44 = vector.broadcast %cst_36 : f32 to vector<8x32xf32>
    %45 = arith.addf %44, %43 : vector<8x32xf32>
    %46 = arith.divf %44, %45 : vector<8x32xf32>
    %47 = arith.mulf %38, %26 : vector<8x32xf32>
    %48 = arith.mulf %32, %40 : vector<8x32xf32>
    %49 = arith.addf %47, %48 : vector<8x32xf32>
    %50 = math.tanh %49 : vector<8x32xf32>
    %51 = arith.mulf %46, %50 : vector<8x32xf32>
    %c0_37 = arith.constant 0 : index
    %c0_38 = arith.constant 0 : index
    %52 = vector.load %arg10[%c0_37, %c0_38] : memref<8x32xf32, #tpu.memory_space<vmem>>, vector<8x32xf32>
    tpu.vector_store %arg10[%c0_37, %c0_38], %51 {strides = array<i32>} : memref<8x32xf32, #tpu.memory_space<vmem>>, vector<8x32xf32>,
    %c0_39 = arith.constant 0 : index
    %c0_40 = arith.constant 0 : index
    %53 = vector.load %arg11[%c0_39, %c0_40] : memref<8x32xf32, #tpu.memory_space<vmem>>, vector<8x32xf32>
    tpu.vector_store %arg11[%c0_39, %c0_40], %49 {strides = array<i32>} : memref<8x32xf32, #tpu.memory_space<vmem>>, vector<8x32xf32>,
    %c0_41 = arith.constant 0 : index
    %c0_42 = arith.constant 0 : index
    %54 = vector.load %arg12[%c0_41, %c0_42] : memref<8x32xf32, #tpu.memory_space<vmem>>, vector<8x32xf32>
    %55 = tpu.concatenate %51, %54 in 1 : vector<8x32xf32>, vector<8x32xf32> -> vector<8x64xf32>
    %cst_43 = arith.constant dense<0.000000e+00> : vector<8x128xf32>
    %56 = tpu.matmul %55, %18, %cst_43 {dimension_numbers = #tpu.dot_dimension_numbers<[1], [0], [0], [1], [0, 0, 1, 1], [], []>} : vector<8x64xf32>, vector<64x128xf32>, vector<8x128xf32> -> vector<8x128xf32>
    %57 = vector.broadcast %19 : vector<1x128xf32> to vector<8x128xf32>
    %58 = arith.addf %56, %57 : vector<8x128xf32>
    %c0_44 = arith.constant 0 : index
    %c0_45 = arith.constant 0 : index
    %59 = vector.load %arg13[%c0_44, %c0_45] : memref<8x32xf32, #tpu.memory_space<vmem>>, vector<8x32xf32>
    %60 = vector.extract_strided_slice %58 {offsets = [0, 0], sizes = [8, 32], strides = [1, 1]} : vector<8x128xf32> to vector<8x32xf32>
    %61 = arith.negf %60 : vector<8x32xf32>
    %62 = math.exp %61 : vector<8x32xf32>
    %cst_46 = arith.constant 1.000000e+00 : f32
    %63 = vector.broadcast %cst_46 : f32 to vector<8x32xf32>
    %64 = arith.addf %63, %62 : vector<8x32xf32>
    %65 = arith.divf %63, %64 : vector<8x32xf32>
    %66 = vector.extract_strided_slice %58 {offsets = [0, 32], sizes = [8, 32], strides = [1, 1]} : vector<8x128xf32> to vector<8x32xf32>
    %67 = arith.negf %66 : vector<8x32xf32>
    %68 = math.exp %67 : vector<8x32xf32>
    %cst_47 = arith.constant 1.000000e+00 : f32
    %69 = vector.broadcast %cst_47 : f32 to vector<8x32xf32>
    %70 = arith.addf %69, %68 : vector<8x32xf32>
    %71 = arith.divf %69, %70 : vector<8x32xf32>
    %72 = vector.extract_strided_slice %58 {offsets = [0, 64], sizes = [8, 32], strides = [1, 1]} : vector<8x128xf32> to vector<8x32xf32>
    %73 = math.tanh %72 : vector<8x32xf32>
    %74 = vector.extract_strided_slice %58 {offsets = [0, 96], sizes = [8, 32], strides = [1, 1]} : vector<8x128xf32> to vector<8x32xf32>
    %75 = arith.negf %74 : vector<8x32xf32>
    %76 = math.exp %75 : vector<8x32xf32>
    %cst_48 = arith.constant 1.000000e+00 : f32
    %77 = vector.broadcast %cst_48 : f32 to vector<8x32xf32>
    %78 = arith.addf %77, %76 : vector<8x32xf32>
    %79 = arith.divf %77, %78 : vector<8x32xf32>
    %80 = arith.mulf %71, %59 : vector<8x32xf32>
    %81 = arith.mulf %65, %73 : vector<8x32xf32>
    %82 = arith.addf %80, %81 : vector<8x32xf32>
    %83 = math.tanh %82 : vector<8x32xf32>
    %84 = arith.mulf %79, %83 : vector<8x32xf32>
    %c0_49 = arith.constant 0 : index
    %c0_50 = arith.constant 0 : index
    %85 = vector.load %arg12[%c0_49, %c0_50] : memref<8x32xf32, #tpu.memory_space<vmem>>, vector<8x32xf32>
    tpu.vector_store %arg12[%c0_49, %c0_50], %84 {strides = array<i32>} : memref<8x32xf32, #tpu.memory_space<vmem>>, vector<8x32xf32>,
    %c0_51 = arith.constant 0 : index
    %c0_52 = arith.constant 0 : index
    %86 = vector.load %arg13[%c0_51, %c0_52] : memref<8x32xf32, #tpu.memory_space<vmem>>, vector<8x32xf32>
    tpu.vector_store %arg13[%c0_51, %c0_52], %82 {strides = array<i32>} : memref<8x32xf32, #tpu.memory_space<vmem>>, vector<8x32xf32>,
    %c1_i32 = arith.constant 1 : i32
    %87 = arith.index_cast %c1_i32 : i32 to index
    %c0_53 = arith.constant 0 : index
    %c0_54 = arith.constant 0 : index
    %88 = vector.load %arg9[%87, %c0_53, %c0_54] : memref<8x8x128xf32, #tpu.memory_space<vmem>>, vector<1x8x128xf32>
    %89 = vector.shape_cast %88 : vector<1x8x128xf32> to vector<8x128xf32>
    %c0_55 = arith.constant 0 : index
    %c0_56 = arith.constant 0 : index
    %90 = vector.load %arg10[%c0_55, %c0_56] : memref<8x32xf32, #tpu.memory_space<vmem>>, vector<8x32xf32>
    %cst_57 = arith.constant dense<0.000000e+00> : vector<8x128xf32>
    %91 = tpu.matmul %90, %17, %cst_57 {dimension_numbers = #tpu.dot_dimension_numbers<[1], [0], [0], [1], [0, 0, 1, 1], [], []>} : vector<8x32xf32>, vector<32x128xf32>, vector<8x128xf32> -> vector<8x128xf32>
    %92 = arith.addf %89, %91 : vector<8x128xf32>
    %c0_58 = arith.constant 0 : index
    %c0_59 = arith.constant 0 : index
    %93 = vector.load %arg11[%c0_58, %c0_59] : memref<8x32xf32, #tpu.memory_space<vmem>>, vector<8x32xf32>
    %94 = vector.extract_strided_slice %92 {offsets = [0, 0], sizes = [8, 32], strides = [1, 1]} : vector<8x128xf32> to vector<8x32xf32>
    %95 = arith.negf %94 : vector<8x32xf32>
    %96 = math.exp %95 : vector<8x32xf32>
    %cst_60 = arith.constant 1.000000e+00 : f32
    %97 = vector.broadcast %cst_60 : f32 to vector<8x32xf32>
    %98 = arith.addf %97, %96 : vector<8x32xf32>
    %99 = arith.divf %97, %98 : vector<8x32xf32>
    %100 = vector.extract_strided_slice %92 {offsets = [0, 32], sizes = [8, 32], strides = [1, 1]} : vector<8x128xf32> to vector<8x32xf32>
    %101 = arith.negf %100 : vector<8x32xf32>
    %102 = math.exp %101 : vector<8x32xf32>
    %cst_61 = arith.constant 1.000000e+00 : f32
    %103 = vector.broadcast %cst_61 : f32 to vector<8x32xf32>
    %104 = arith.addf %103, %102 : vector<8x32xf32>
    %105 = arith.divf %103, %104 : vector<8x32xf32>
    %106 = vector.extract_strided_slice %92 {offsets = [0, 64], sizes = [8, 32], strides = [1, 1]} : vector<8x128xf32> to vector<8x32xf32>
    %107 = math.tanh %106 : vector<8x32xf32>
    %108 = vector.extract_strided_slice %92 {offsets = [0, 96], sizes = [8, 32], strides = [1, 1]} : vector<8x128xf32> to vector<8x32xf32>
    %109 = arith.negf %108 : vector<8x32xf32>
    %110 = math.exp %109 : vector<8x32xf32>
    %cst_62 = arith.constant 1.000000e+00 : f32
    %111 = vector.broadcast %cst_62 : f32 to vector<8x32xf32>
    %112 = arith.addf %111, %110 : vector<8x32xf32>
    %113 = arith.divf %111, %112 : vector<8x32xf32>
    %114 = arith.mulf %105, %93 : vector<8x32xf32>
    %115 = arith.mulf %99, %107 : vector<8x32xf32>
    %116 = arith.addf %114, %115 : vector<8x32xf32>
    %117 = math.tanh %116 : vector<8x32xf32>
    %118 = arith.mulf %113, %117 : vector<8x32xf32>
    %c0_63 = arith.constant 0 : index
    %c0_64 = arith.constant 0 : index
    %119 = vector.load %arg10[%c0_63, %c0_64] : memref<8x32xf32, #tpu.memory_space<vmem>>, vector<8x32xf32>
    tpu.vector_store %arg10[%c0_63, %c0_64], %118 {strides = array<i32>} : memref<8x32xf32, #tpu.memory_space<vmem>>, vector<8x32xf32>,
    %c0_65 = arith.constant 0 : index
    %c0_66 = arith.constant 0 : index
    %120 = vector.load %arg11[%c0_65, %c0_66] : memref<8x32xf32, #tpu.memory_space<vmem>>, vector<8x32xf32>
    tpu.vector_store %arg11[%c0_65, %c0_66], %116 {strides = array<i32>} : memref<8x32xf32, #tpu.memory_space<vmem>>, vector<8x32xf32>,
    %c0_67 = arith.constant 0 : index
    %c0_68 = arith.constant 0 : index
    %121 = vector.load %arg12[%c0_67, %c0_68] : memref<8x32xf32, #tpu.memory_space<vmem>>, vector<8x32xf32>
    %122 = tpu.concatenate %118, %121 in 1 : vector<8x32xf32>, vector<8x32xf32> -> vector<8x64xf32>
    %cst_69 = arith.constant dense<0.000000e+00> : vector<8x128xf32>
    %123 = tpu.matmul %122, %18, %cst_69 {dimension_numbers = #tpu.dot_dimension_numbers<[1], [0], [0], [1], [0, 0, 1, 1], [], []>} : vector<8x64xf32>, vector<64x128xf32>, vector<8x128xf32> -> vector<8x128xf32>
    %124 = vector.broadcast %19 : vector<1x128xf32> to vector<8x128xf32>
    %125 = arith.addf %123, %124 : vector<8x128xf32>
    %c0_70 = arith.constant 0 : index
    %c0_71 = arith.constant 0 : index
    %126 = vector.load %arg13[%c0_70, %c0_71] : memref<8x32xf32, #tpu.memory_space<vmem>>, vector<8x32xf32>
    %127 = vector.extract_strided_slice %125 {offsets = [0, 0], sizes = [8, 32], strides = [1, 1]} : vector<8x128xf32> to vector<8x32xf32>
    %128 = arith.negf %127 : vector<8x32xf32>
    %129 = math.exp %128 : vector<8x32xf32>
    %cst_72 = arith.constant 1.000000e+00 : f32
    %130 = vector.broadcast %cst_72 : f32 to vector<8x32xf32>
    %131 = arith.addf %130, %129 : vector<8x32xf32>
    %132 = arith.divf %130, %131 : vector<8x32xf32>
    %133 = vector.extract_strided_slice %125 {offsets = [0, 32], sizes = [8, 32], strides = [1, 1]} : vector<8x128xf32> to vector<8x32xf32>
    %134 = arith.negf %133 : vector<8x32xf32>
    %135 = math.exp %134 : vector<8x32xf32>
    %cst_73 = arith.constant 1.000000e+00 : f32
    %136 = vector.broadcast %cst_73 : f32 to vector<8x32xf32>
    %137 = arith.addf %136, %135 : vector<8x32xf32>
    %138 = arith.divf %136, %137 : vector<8x32xf32>
    %139 = vector.extract_strided_slice %125 {offsets = [0, 64], sizes = [8, 32], strides = [1, 1]} : vector<8x128xf32> to vector<8x32xf32>
    %140 = math.tanh %139 : vector<8x32xf32>
    %141 = vector.extract_strided_slice %125 {offsets = [0, 96], sizes = [8, 32], strides = [1, 1]} : vector<8x128xf32> to vector<8x32xf32>
    %142 = arith.negf %141 : vector<8x32xf32>
    %143 = math.exp %142 : vector<8x32xf32>
    %cst_74 = arith.constant 1.000000e+00 : f32
    %144 = vector.broadcast %cst_74 : f32 to vector<8x32xf32>
    %145 = arith.addf %144, %143 : vector<8x32xf32>
    %146 = arith.divf %144, %145 : vector<8x32xf32>
    %147 = arith.mulf %138, %126 : vector<8x32xf32>
    %148 = arith.mulf %132, %140 : vector<8x32xf32>
    %149 = arith.addf %147, %148 : vector<8x32xf32>
    %150 = math.tanh %149 : vector<8x32xf32>
    %151 = arith.mulf %146, %150 : vector<8x32xf32>
    %c0_75 = arith.constant 0 : index
    %c0_76 = arith.constant 0 : index
    %152 = vector.load %arg12[%c0_75, %c0_76] : memref<8x32xf32, #tpu.memory_space<vmem>>, vector<8x32xf32>
    tpu.vector_store %arg12[%c0_75, %c0_76], %151 {strides = array<i32>} : memref<8x32xf32, #tpu.memory_space<vmem>>, vector<8x32xf32>,
    %c0_77 = arith.constant 0 : index
    %c0_78 = arith.constant 0 : index
    %153 = vector.load %arg13[%c0_77, %c0_78] : memref<8x32xf32, #tpu.memory_space<vmem>>, vector<8x32xf32>
    tpu.vector_store %arg13[%c0_77, %c0_78], %149 {strides = array<i32>} : memref<8x32xf32, #tpu.memory_space<vmem>>, vector<8x32xf32>,
    %c2_i32 = arith.constant 2 : i32
    %154 = arith.index_cast %c2_i32 : i32 to index
    %c0_79 = arith.constant 0 : index
    %c0_80 = arith.constant 0 : index
    %155 = vector.load %arg9[%154, %c0_79, %c0_80] : memref<8x8x128xf32, #tpu.memory_space<vmem>>, vector<1x8x128xf32>
    %156 = vector.shape_cast %155 : vector<1x8x128xf32> to vector<8x128xf32>
    %c0_81 = arith.constant 0 : index
    %c0_82 = arith.constant 0 : index
    %157 = vector.load %arg10[%c0_81, %c0_82] : memref<8x32xf32, #tpu.memory_space<vmem>>, vector<8x32xf32>
    %cst_83 = arith.constant dense<0.000000e+00> : vector<8x128xf32>
    %158 = tpu.matmul %157, %17, %cst_83 {dimension_numbers = #tpu.dot_dimension_numbers<[1], [0], [0], [1], [0, 0, 1, 1], [], []>} : vector<8x32xf32>, vector<32x128xf32>, vector<8x128xf32> -> vector<8x128xf32>
    %159 = arith.addf %156, %158 : vector<8x128xf32>
    %c0_84 = arith.constant 0 : index
    %c0_85 = arith.constant 0 : index
    %160 = vector.load %arg11[%c0_84, %c0_85] : memref<8x32xf32, #tpu.memory_space<vmem>>, vector<8x32xf32>
    %161 = vector.extract_strided_slice %159 {offsets = [0, 0], sizes = [8, 32], strides = [1, 1]} : vector<8x128xf32> to vector<8x32xf32>
    %162 = arith.negf %161 : vector<8x32xf32>
    %163 = math.exp %162 : vector<8x32xf32>
    %cst_86 = arith.constant 1.000000e+00 : f32
    %164 = vector.broadcast %cst_86 : f32 to vector<8x32xf32>
    %165 = arith.addf %164, %163 : vector<8x32xf32>
    %166 = arith.divf %164, %165 : vector<8x32xf32>
    %167 = vector.extract_strided_slice %159 {offsets = [0, 32], sizes = [8, 32], strides = [1, 1]} : vector<8x128xf32> to vector<8x32xf32>
    %168 = arith.negf %167 : vector<8x32xf32>
    %169 = math.exp %168 : vector<8x32xf32>
    %cst_87 = arith.constant 1.000000e+00 : f32
    %170 = vector.broadcast %cst_87 : f32 to vector<8x32xf32>
    %171 = arith.addf %170, %169 : vector<8x32xf32>
    %172 = arith.divf %170, %171 : vector<8x32xf32>
    %173 = vector.extract_strided_slice %159 {offsets = [0, 64], sizes = [8, 32], strides = [1, 1]} : vector<8x128xf32> to vector<8x32xf32>
    %174 = math.tanh %173 : vector<8x32xf32>
    %175 = vector.extract_strided_slice %159 {offsets = [0, 96], sizes = [8, 32], strides = [1, 1]} : vector<8x128xf32> to vector<8x32xf32>
    %176 = arith.negf %175 : vector<8x32xf32>
    %177 = math.exp %176 : vector<8x32xf32>
    %cst_88 = arith.constant 1.000000e+00 : f32
    %178 = vector.broadcast %cst_88 : f32 to vector<8x32xf32>
    %179 = arith.addf %178, %177 : vector<8x32xf32>
    %180 = arith.divf %178, %179 : vector<8x32xf32>
    %181 = arith.mulf %172, %160 : vector<8x32xf32>
    %182 = arith.mulf %166, %174 : vector<8x32xf32>
    %183 = arith.addf %181, %182 : vector<8x32xf32>
    %184 = math.tanh %183 : vector<8x32xf32>
    %185 = arith.mulf %180, %184 : vector<8x32xf32>
    %c0_89 = arith.constant 0 : index
    %c0_90 = arith.constant 0 : index
    %186 = vector.load %arg10[%c0_89, %c0_90] : memref<8x32xf32, #tpu.memory_space<vmem>>, vector<8x32xf32>
    tpu.vector_store %arg10[%c0_89, %c0_90], %185 {strides = array<i32>} : memref<8x32xf32, #tpu.memory_space<vmem>>, vector<8x32xf32>,
    %c0_91 = arith.constant 0 : index
    %c0_92 = arith.constant 0 : index
    %187 = vector.load %arg11[%c0_91, %c0_92] : memref<8x32xf32, #tpu.memory_space<vmem>>, vector<8x32xf32>
    tpu.vector_store %arg11[%c0_91, %c0_92], %183 {strides = array<i32>} : memref<8x32xf32, #tpu.memory_space<vmem>>, vector<8x32xf32>,
    %c0_93 = arith.constant 0 : index
    %c0_94 = arith.constant 0 : index
    %188 = vector.load %arg12[%c0_93, %c0_94] : memref<8x32xf32, #tpu.memory_space<vmem>>, vector<8x32xf32>
    %189 = tpu.concatenate %185, %188 in 1 : vector<8x32xf32>, vector<8x32xf32> -> vector<8x64xf32>
    %cst_95 = arith.constant dense<0.000000e+00> : vector<8x128xf32>
    %190 = tpu.matmul %189, %18, %cst_95 {dimension_numbers = #tpu.dot_dimension_numbers<[1], [0], [0], [1], [0, 0, 1, 1], [], []>} : vector<8x64xf32>, vector<64x128xf32>, vector<8x128xf32> -> vector<8x128xf32>
    %191 = vector.broadcast %19 : vector<1x128xf32> to vector<8x128xf32>
    %192 = arith.addf %190, %191 : vector<8x128xf32>
    %c0_96 = arith.constant 0 : index
    %c0_97 = arith.constant 0 : index
    %193 = vector.load %arg13[%c0_96, %c0_97] : memref<8x32xf32, #tpu.memory_space<vmem>>, vector<8x32xf32>
    %194 = vector.extract_strided_slice %192 {offsets = [0, 0], sizes = [8, 32], strides = [1, 1]} : vector<8x128xf32> to vector<8x32xf32>
    %195 = arith.negf %194 : vector<8x32xf32>
    %196 = math.exp %195 : vector<8x32xf32>
    %cst_98 = arith.constant 1.000000e+00 : f32
    %197 = vector.broadcast %cst_98 : f32 to vector<8x32xf32>
    %198 = arith.addf %197, %196 : vector<8x32xf32>
    %199 = arith.divf %197, %198 : vector<8x32xf32>
    %200 = vector.extract_strided_slice %192 {offsets = [0, 32], sizes = [8, 32], strides = [1, 1]} : vector<8x128xf32> to vector<8x32xf32>
    %201 = arith.negf %200 : vector<8x32xf32>
    %202 = math.exp %201 : vector<8x32xf32>
    %cst_99 = arith.constant 1.000000e+00 : f32
    %203 = vector.broadcast %cst_99 : f32 to vector<8x32xf32>
    %204 = arith.addf %203, %202 : vector<8x32xf32>
    %205 = arith.divf %203, %204 : vector<8x32xf32>
    %206 = vector.extract_strided_slice %192 {offsets = [0, 64], sizes = [8, 32], strides = [1, 1]} : vector<8x128xf32> to vector<8x32xf32>
    %207 = math.tanh %206 : vector<8x32xf32>
    %208 = vector.extract_strided_slice %192 {offsets = [0, 96], sizes = [8, 32], strides = [1, 1]} : vector<8x128xf32> to vector<8x32xf32>
    %209 = arith.negf %208 : vector<8x32xf32>
    %210 = math.exp %209 : vector<8x32xf32>
    %cst_100 = arith.constant 1.000000e+00 : f32
    %211 = vector.broadcast %cst_100 : f32 to vector<8x32xf32>
    %212 = arith.addf %211, %210 : vector<8x32xf32>
    %213 = arith.divf %211, %212 : vector<8x32xf32>
    %214 = arith.mulf %205, %193 : vector<8x32xf32>
    %215 = arith.mulf %199, %207 : vector<8x32xf32>
    %216 = arith.addf %214, %215 : vector<8x32xf32>
    %217 = math.tanh %216 : vector<8x32xf32>
    %218 = arith.mulf %213, %217 : vector<8x32xf32>
    %c0_101 = arith.constant 0 : index
    %c0_102 = arith.constant 0 : index
    %219 = vector.load %arg12[%c0_101, %c0_102] : memref<8x32xf32, #tpu.memory_space<vmem>>, vector<8x32xf32>
    tpu.vector_store %arg12[%c0_101, %c0_102], %218 {strides = array<i32>} : memref<8x32xf32, #tpu.memory_space<vmem>>, vector<8x32xf32>,
    %c0_103 = arith.constant 0 : index
    %c0_104 = arith.constant 0 : index
    %220 = vector.load %arg13[%c0_103, %c0_104] : memref<8x32xf32, #tpu.memory_space<vmem>>, vector<8x32xf32>
    tpu.vector_store %arg13[%c0_103, %c0_104], %216 {strides = array<i32>} : memref<8x32xf32, #tpu.memory_space<vmem>>, vector<8x32xf32>,
    %c3_i32 = arith.constant 3 : i32
    %221 = arith.index_cast %c3_i32 : i32 to index
    %c0_105 = arith.constant 0 : index
    %c0_106 = arith.constant 0 : index
    %222 = vector.load %arg9[%221, %c0_105, %c0_106] : memref<8x8x128xf32, #tpu.memory_space<vmem>>, vector<1x8x128xf32>
    %223 = vector.shape_cast %222 : vector<1x8x128xf32> to vector<8x128xf32>
    %c0_107 = arith.constant 0 : index
    %c0_108 = arith.constant 0 : index
    %224 = vector.load %arg10[%c0_107, %c0_108] : memref<8x32xf32, #tpu.memory_space<vmem>>, vector<8x32xf32>
    %cst_109 = arith.constant dense<0.000000e+00> : vector<8x128xf32>
    %225 = tpu.matmul %224, %17, %cst_109 {dimension_numbers = #tpu.dot_dimension_numbers<[1], [0], [0], [1], [0, 0, 1, 1], [], []>} : vector<8x32xf32>, vector<32x128xf32>, vector<8x128xf32> -> vector<8x128xf32>
    %226 = arith.addf %223, %225 : vector<8x128xf32>
    %c0_110 = arith.constant 0 : index
    %c0_111 = arith.constant 0 : index
    %227 = vector.load %arg11[%c0_110, %c0_111] : memref<8x32xf32, #tpu.memory_space<vmem>>, vector<8x32xf32>
    %228 = vector.extract_strided_slice %226 {offsets = [0, 0], sizes = [8, 32], strides = [1, 1]} : vector<8x128xf32> to vector<8x32xf32>
    %229 = arith.negf %228 : vector<8x32xf32>
    %230 = math.exp %229 : vector<8x32xf32>
    %cst_112 = arith.constant 1.000000e+00 : f32
    %231 = vector.broadcast %cst_112 : f32 to vector<8x32xf32>
    %232 = arith.addf %231, %230 : vector<8x32xf32>
    %233 = arith.divf %231, %232 : vector<8x32xf32>
    %234 = vector.extract_strided_slice %226 {offsets = [0, 32], sizes = [8, 32], strides = [1, 1]} : vector<8x128xf32> to vector<8x32xf32>
    %235 = arith.negf %234 : vector<8x32xf32>
    %236 = math.exp %235 : vector<8x32xf32>
    %cst_113 = arith.constant 1.000000e+00 : f32
    %237 = vector.broadcast %cst_113 : f32 to vector<8x32xf32>
    %238 = arith.addf %237, %236 : vector<8x32xf32>
    %239 = arith.divf %237, %238 : vector<8x32xf32>
    %240 = vector.extract_strided_slice %226 {offsets = [0, 64], sizes = [8, 32], strides = [1, 1]} : vector<8x128xf32> to vector<8x32xf32>
    %241 = math.tanh %240 : vector<8x32xf32>
    %242 = vector.extract_strided_slice %226 {offsets = [0, 96], sizes = [8, 32], strides = [1, 1]} : vector<8x128xf32> to vector<8x32xf32>
    %243 = arith.negf %242 : vector<8x32xf32>
    %244 = math.exp %243 : vector<8x32xf32>
    %cst_114 = arith.constant 1.000000e+00 : f32
    %245 = vector.broadcast %cst_114 : f32 to vector<8x32xf32>
    %246 = arith.addf %245, %244 : vector<8x32xf32>
    %247 = arith.divf %245, %246 : vector<8x32xf32>
    %248 = arith.mulf %239, %227 : vector<8x32xf32>
    %249 = arith.mulf %233, %241 : vector<8x32xf32>
    %250 = arith.addf %248, %249 : vector<8x32xf32>
    %251 = math.tanh %250 : vector<8x32xf32>
    %252 = arith.mulf %247, %251 : vector<8x32xf32>
    %c0_115 = arith.constant 0 : index
    %c0_116 = arith.constant 0 : index
    %253 = vector.load %arg10[%c0_115, %c0_116] : memref<8x32xf32, #tpu.memory_space<vmem>>, vector<8x32xf32>
    tpu.vector_store %arg10[%c0_115, %c0_116], %252 {strides = array<i32>} : memref<8x32xf32, #tpu.memory_space<vmem>>, vector<8x32xf32>,
    %c0_117 = arith.constant 0 : index
    %c0_118 = arith.constant 0 : index
    %254 = vector.load %arg11[%c0_117, %c0_118] : memref<8x32xf32, #tpu.memory_space<vmem>>, vector<8x32xf32>
    tpu.vector_store %arg11[%c0_117, %c0_118], %250 {strides = array<i32>} : memref<8x32xf32, #tpu.memory_space<vmem>>, vector<8x32xf32>,
    %c0_119 = arith.constant 0 : index
    %c0_120 = arith.constant 0 : index
    %255 = vector.load %arg12[%c0_119, %c0_120] : memref<8x32xf32, #tpu.memory_space<vmem>>, vector<8x32xf32>
    %256 = tpu.concatenate %252, %255 in 1 : vector<8x32xf32>, vector<8x32xf32> -> vector<8x64xf32>
    %cst_121 = arith.constant dense<0.000000e+00> : vector<8x128xf32>
    %257 = tpu.matmul %256, %18, %cst_121 {dimension_numbers = #tpu.dot_dimension_numbers<[1], [0], [0], [1], [0, 0, 1, 1], [], []>} : vector<8x64xf32>, vector<64x128xf32>, vector<8x128xf32> -> vector<8x128xf32>
    %258 = vector.broadcast %19 : vector<1x128xf32> to vector<8x128xf32>
    %259 = arith.addf %257, %258 : vector<8x128xf32>
    %c0_122 = arith.constant 0 : index
    %c0_123 = arith.constant 0 : index
    %260 = vector.load %arg13[%c0_122, %c0_123] : memref<8x32xf32, #tpu.memory_space<vmem>>, vector<8x32xf32>
    %261 = vector.extract_strided_slice %259 {offsets = [0, 0], sizes = [8, 32], strides = [1, 1]} : vector<8x128xf32> to vector<8x32xf32>
    %262 = arith.negf %261 : vector<8x32xf32>
    %263 = math.exp %262 : vector<8x32xf32>
    %cst_124 = arith.constant 1.000000e+00 : f32
    %264 = vector.broadcast %cst_124 : f32 to vector<8x32xf32>
    %265 = arith.addf %264, %263 : vector<8x32xf32>
    %266 = arith.divf %264, %265 : vector<8x32xf32>
    %267 = vector.extract_strided_slice %259 {offsets = [0, 32], sizes = [8, 32], strides = [1, 1]} : vector<8x128xf32> to vector<8x32xf32>
    %268 = arith.negf %267 : vector<8x32xf32>
    %269 = math.exp %268 : vector<8x32xf32>
    %cst_125 = arith.constant 1.000000e+00 : f32
    %270 = vector.broadcast %cst_125 : f32 to vector<8x32xf32>
    %271 = arith.addf %270, %269 : vector<8x32xf32>
    %272 = arith.divf %270, %271 : vector<8x32xf32>
    %273 = vector.extract_strided_slice %259 {offsets = [0, 64], sizes = [8, 32], strides = [1, 1]} : vector<8x128xf32> to vector<8x32xf32>
    %274 = math.tanh %273 : vector<8x32xf32>
    %275 = vector.extract_strided_slice %259 {offsets = [0, 96], sizes = [8, 32], strides = [1, 1]} : vector<8x128xf32> to vector<8x32xf32>
    %276 = arith.negf %275 : vector<8x32xf32>
    %277 = math.exp %276 : vector<8x32xf32>
    %cst_126 = arith.constant 1.000000e+00 : f32
    %278 = vector.broadcast %cst_126 : f32 to vector<8x32xf32>
    %279 = arith.addf %278, %277 : vector<8x32xf32>
    %280 = arith.divf %278, %279 : vector<8x32xf32>
    %281 = arith.mulf %272, %260 : vector<8x32xf32>
    %282 = arith.mulf %266, %274 : vector<8x32xf32>
    %283 = arith.addf %281, %282 : vector<8x32xf32>
    %284 = math.tanh %283 : vector<8x32xf32>
    %285 = arith.mulf %280, %284 : vector<8x32xf32>
    %c0_127 = arith.constant 0 : index
    %c0_128 = arith.constant 0 : index
    %286 = vector.load %arg12[%c0_127, %c0_128] : memref<8x32xf32, #tpu.memory_space<vmem>>, vector<8x32xf32>
    tpu.vector_store %arg12[%c0_127, %c0_128], %285 {strides = array<i32>} : memref<8x32xf32, #tpu.memory_space<vmem>>, vector<8x32xf32>,
    %c0_129 = arith.constant 0 : index
    %c0_130 = arith.constant 0 : index
    %287 = vector.load %arg13[%c0_129, %c0_130] : memref<8x32xf32, #tpu.memory_space<vmem>>, vector<8x32xf32>
    tpu.vector_store %arg13[%c0_129, %c0_130], %283 {strides = array<i32>} : memref<8x32xf32, #tpu.memory_space<vmem>>, vector<8x32xf32>,
    %c4_i32 = arith.constant 4 : i32
    %288 = arith.index_cast %c4_i32 : i32 to index
    %c0_131 = arith.constant 0 : index
    %c0_132 = arith.constant 0 : index
    %289 = vector.load %arg9[%288, %c0_131, %c0_132] : memref<8x8x128xf32, #tpu.memory_space<vmem>>, vector<1x8x128xf32>
    %290 = vector.shape_cast %289 : vector<1x8x128xf32> to vector<8x128xf32>
    %c0_133 = arith.constant 0 : index
    %c0_134 = arith.constant 0 : index
    %291 = vector.load %arg10[%c0_133, %c0_134] : memref<8x32xf32, #tpu.memory_space<vmem>>, vector<8x32xf32>
    %cst_135 = arith.constant dense<0.000000e+00> : vector<8x128xf32>
    %292 = tpu.matmul %291, %17, %cst_135 {dimension_numbers = #tpu.dot_dimension_numbers<[1], [0], [0], [1], [0, 0, 1, 1], [], []>} : vector<8x32xf32>, vector<32x128xf32>, vector<8x128xf32> -> vector<8x128xf32>
    %293 = arith.addf %290, %292 : vector<8x128xf32>
    %c0_136 = arith.constant 0 : index
    %c0_137 = arith.constant 0 : index
    %294 = vector.load %arg11[%c0_136, %c0_137] : memref<8x32xf32, #tpu.memory_space<vmem>>, vector<8x32xf32>
    %295 = vector.extract_strided_slice %293 {offsets = [0, 0], sizes = [8, 32], strides = [1, 1]} : vector<8x128xf32> to vector<8x32xf32>
    %296 = arith.negf %295 : vector<8x32xf32>
    %297 = math.exp %296 : vector<8x32xf32>
    %cst_138 = arith.constant 1.000000e+00 : f32
    %298 = vector.broadcast %cst_138 : f32 to vector<8x32xf32>
    %299 = arith.addf %298, %297 : vector<8x32xf32>
    %300 = arith.divf %298, %299 : vector<8x32xf32>
    %301 = vector.extract_strided_slice %293 {offsets = [0, 32], sizes = [8, 32], strides = [1, 1]} : vector<8x128xf32> to vector<8x32xf32>
    %302 = arith.negf %301 : vector<8x32xf32>
    %303 = math.exp %302 : vector<8x32xf32>
    %cst_139 = arith.constant 1.000000e+00 : f32
    %304 = vector.broadcast %cst_139 : f32 to vector<8x32xf32>
    %305 = arith.addf %304, %303 : vector<8x32xf32>
    %306 = arith.divf %304, %305 : vector<8x32xf32>
    %307 = vector.extract_strided_slice %293 {offsets = [0, 64], sizes = [8, 32], strides = [1, 1]} : vector<8x128xf32> to vector<8x32xf32>
    %308 = math.tanh %307 : vector<8x32xf32>
    %309 = vector.extract_strided_slice %293 {offsets = [0, 96], sizes = [8, 32], strides = [1, 1]} : vector<8x128xf32> to vector<8x32xf32>
    %310 = arith.negf %309 : vector<8x32xf32>
    %311 = math.exp %310 : vector<8x32xf32>
    %cst_140 = arith.constant 1.000000e+00 : f32
    %312 = vector.broadcast %cst_140 : f32 to vector<8x32xf32>
    %313 = arith.addf %312, %311 : vector<8x32xf32>
    %314 = arith.divf %312, %313 : vector<8x32xf32>
    %315 = arith.mulf %306, %294 : vector<8x32xf32>
    %316 = arith.mulf %300, %308 : vector<8x32xf32>
    %317 = arith.addf %315, %316 : vector<8x32xf32>
    %318 = math.tanh %317 : vector<8x32xf32>
    %319 = arith.mulf %314, %318 : vector<8x32xf32>
    %c0_141 = arith.constant 0 : index
    %c0_142 = arith.constant 0 : index
    %320 = vector.load %arg10[%c0_141, %c0_142] : memref<8x32xf32, #tpu.memory_space<vmem>>, vector<8x32xf32>
    tpu.vector_store %arg10[%c0_141, %c0_142], %319 {strides = array<i32>} : memref<8x32xf32, #tpu.memory_space<vmem>>, vector<8x32xf32>,
    %c0_143 = arith.constant 0 : index
    %c0_144 = arith.constant 0 : index
    %321 = vector.load %arg11[%c0_143, %c0_144] : memref<8x32xf32, #tpu.memory_space<vmem>>, vector<8x32xf32>
    tpu.vector_store %arg11[%c0_143, %c0_144], %317 {strides = array<i32>} : memref<8x32xf32, #tpu.memory_space<vmem>>, vector<8x32xf32>,
    %c0_145 = arith.constant 0 : index
    %c0_146 = arith.constant 0 : index
    %322 = vector.load %arg12[%c0_145, %c0_146] : memref<8x32xf32, #tpu.memory_space<vmem>>, vector<8x32xf32>
    %323 = tpu.concatenate %319, %322 in 1 : vector<8x32xf32>, vector<8x32xf32> -> vector<8x64xf32>
    %cst_147 = arith.constant dense<0.000000e+00> : vector<8x128xf32>
    %324 = tpu.matmul %323, %18, %cst_147 {dimension_numbers = #tpu.dot_dimension_numbers<[1], [0], [0], [1], [0, 0, 1, 1], [], []>} : vector<8x64xf32>, vector<64x128xf32>, vector<8x128xf32> -> vector<8x128xf32>
    %325 = vector.broadcast %19 : vector<1x128xf32> to vector<8x128xf32>
    %326 = arith.addf %324, %325 : vector<8x128xf32>
    %c0_148 = arith.constant 0 : index
    %c0_149 = arith.constant 0 : index
    %327 = vector.load %arg13[%c0_148, %c0_149] : memref<8x32xf32, #tpu.memory_space<vmem>>, vector<8x32xf32>
    %328 = vector.extract_strided_slice %326 {offsets = [0, 0], sizes = [8, 32], strides = [1, 1]} : vector<8x128xf32> to vector<8x32xf32>
    %329 = arith.negf %328 : vector<8x32xf32>
    %330 = math.exp %329 : vector<8x32xf32>
    %cst_150 = arith.constant 1.000000e+00 : f32
    %331 = vector.broadcast %cst_150 : f32 to vector<8x32xf32>
    %332 = arith.addf %331, %330 : vector<8x32xf32>
    %333 = arith.divf %331, %332 : vector<8x32xf32>
    %334 = vector.extract_strided_slice %326 {offsets = [0, 32], sizes = [8, 32], strides = [1, 1]} : vector<8x128xf32> to vector<8x32xf32>
    %335 = arith.negf %334 : vector<8x32xf32>
    %336 = math.exp %335 : vector<8x32xf32>
    %cst_151 = arith.constant 1.000000e+00 : f32
    %337 = vector.broadcast %cst_151 : f32 to vector<8x32xf32>
    %338 = arith.addf %337, %336 : vector<8x32xf32>
    %339 = arith.divf %337, %338 : vector<8x32xf32>
    %340 = vector.extract_strided_slice %326 {offsets = [0, 64], sizes = [8, 32], strides = [1, 1]} : vector<8x128xf32> to vector<8x32xf32>
    %341 = math.tanh %340 : vector<8x32xf32>
    %342 = vector.extract_strided_slice %326 {offsets = [0, 96], sizes = [8, 32], strides = [1, 1]} : vector<8x128xf32> to vector<8x32xf32>
    %343 = arith.negf %342 : vector<8x32xf32>
    %344 = math.exp %343 : vector<8x32xf32>
    %cst_152 = arith.constant 1.000000e+00 : f32
    %345 = vector.broadcast %cst_152 : f32 to vector<8x32xf32>
    %346 = arith.addf %345, %344 : vector<8x32xf32>
    %347 = arith.divf %345, %346 : vector<8x32xf32>
    %348 = arith.mulf %339, %327 : vector<8x32xf32>
    %349 = arith.mulf %333, %341 : vector<8x32xf32>
    %350 = arith.addf %348, %349 : vector<8x32xf32>
    %351 = math.tanh %350 : vector<8x32xf32>
    %352 = arith.mulf %347, %351 : vector<8x32xf32>
    %c0_153 = arith.constant 0 : index
    %c0_154 = arith.constant 0 : index
    %353 = vector.load %arg12[%c0_153, %c0_154] : memref<8x32xf32, #tpu.memory_space<vmem>>, vector<8x32xf32>
    tpu.vector_store %arg12[%c0_153, %c0_154], %352 {strides = array<i32>} : memref<8x32xf32, #tpu.memory_space<vmem>>, vector<8x32xf32>,
    %c0_155 = arith.constant 0 : index
    %c0_156 = arith.constant 0 : index
    %354 = vector.load %arg13[%c0_155, %c0_156] : memref<8x32xf32, #tpu.memory_space<vmem>>, vector<8x32xf32>
    tpu.vector_store %arg13[%c0_155, %c0_156], %350 {strides = array<i32>} : memref<8x32xf32, #tpu.memory_space<vmem>>, vector<8x32xf32>,
    %c5_i32 = arith.constant 5 : i32
    %355 = arith.index_cast %c5_i32 : i32 to index
    %c0_157 = arith.constant 0 : index
    %c0_158 = arith.constant 0 : index
    %356 = vector.load %arg9[%355, %c0_157, %c0_158] : memref<8x8x128xf32, #tpu.memory_space<vmem>>, vector<1x8x128xf32>
    %357 = vector.shape_cast %356 : vector<1x8x128xf32> to vector<8x128xf32>
    %c0_159 = arith.constant 0 : index
    %c0_160 = arith.constant 0 : index
    %358 = vector.load %arg10[%c0_159, %c0_160] : memref<8x32xf32, #tpu.memory_space<vmem>>, vector<8x32xf32>
    %cst_161 = arith.constant dense<0.000000e+00> : vector<8x128xf32>
    %359 = tpu.matmul %358, %17, %cst_161 {dimension_numbers = #tpu.dot_dimension_numbers<[1], [0], [0], [1], [0, 0, 1, 1], [], []>} : vector<8x32xf32>, vector<32x128xf32>, vector<8x128xf32> -> vector<8x128xf32>
    %360 = arith.addf %357, %359 : vector<8x128xf32>
    %c0_162 = arith.constant 0 : index
    %c0_163 = arith.constant 0 : index
    %361 = vector.load %arg11[%c0_162, %c0_163] : memref<8x32xf32, #tpu.memory_space<vmem>>, vector<8x32xf32>
    %362 = vector.extract_strided_slice %360 {offsets = [0, 0], sizes = [8, 32], strides = [1, 1]} : vector<8x128xf32> to vector<8x32xf32>
    %363 = arith.negf %362 : vector<8x32xf32>
    %364 = math.exp %363 : vector<8x32xf32>
    %cst_164 = arith.constant 1.000000e+00 : f32
    %365 = vector.broadcast %cst_164 : f32 to vector<8x32xf32>
    %366 = arith.addf %365, %364 : vector<8x32xf32>
    %367 = arith.divf %365, %366 : vector<8x32xf32>
    %368 = vector.extract_strided_slice %360 {offsets = [0, 32], sizes = [8, 32], strides = [1, 1]} : vector<8x128xf32> to vector<8x32xf32>
    %369 = arith.negf %368 : vector<8x32xf32>
    %370 = math.exp %369 : vector<8x32xf32>
    %cst_165 = arith.constant 1.000000e+00 : f32
    %371 = vector.broadcast %cst_165 : f32 to vector<8x32xf32>
    %372 = arith.addf %371, %370 : vector<8x32xf32>
    %373 = arith.divf %371, %372 : vector<8x32xf32>
    %374 = vector.extract_strided_slice %360 {offsets = [0, 64], sizes = [8, 32], strides = [1, 1]} : vector<8x128xf32> to vector<8x32xf32>
    %375 = math.tanh %374 : vector<8x32xf32>
    %376 = vector.extract_strided_slice %360 {offsets = [0, 96], sizes = [8, 32], strides = [1, 1]} : vector<8x128xf32> to vector<8x32xf32>
    %377 = arith.negf %376 : vector<8x32xf32>
    %378 = math.exp %377 : vector<8x32xf32>
    %cst_166 = arith.constant 1.000000e+00 : f32
    %379 = vector.broadcast %cst_166 : f32 to vector<8x32xf32>
    %380 = arith.addf %379, %378 : vector<8x32xf32>
    %381 = arith.divf %379, %380 : vector<8x32xf32>
    %382 = arith.mulf %373, %361 : vector<8x32xf32>
    %383 = arith.mulf %367, %375 : vector<8x32xf32>
    %384 = arith.addf %382, %383 : vector<8x32xf32>
    %385 = math.tanh %384 : vector<8x32xf32>
    %386 = arith.mulf %381, %385 : vector<8x32xf32>
    %c0_167 = arith.constant 0 : index
    %c0_168 = arith.constant 0 : index
    %387 = vector.load %arg10[%c0_167, %c0_168] : memref<8x32xf32, #tpu.memory_space<vmem>>, vector<8x32xf32>
    tpu.vector_store %arg10[%c0_167, %c0_168], %386 {strides = array<i32>} : memref<8x32xf32, #tpu.memory_space<vmem>>, vector<8x32xf32>,
    %c0_169 = arith.constant 0 : index
    %c0_170 = arith.constant 0 : index
    %388 = vector.load %arg11[%c0_169, %c0_170] : memref<8x32xf32, #tpu.memory_space<vmem>>, vector<8x32xf32>
    tpu.vector_store %arg11[%c0_169, %c0_170], %384 {strides = array<i32>} : memref<8x32xf32, #tpu.memory_space<vmem>>, vector<8x32xf32>,
    %c0_171 = arith.constant 0 : index
    %c0_172 = arith.constant 0 : index
    %389 = vector.load %arg12[%c0_171, %c0_172] : memref<8x32xf32, #tpu.memory_space<vmem>>, vector<8x32xf32>
    %390 = tpu.concatenate %386, %389 in 1 : vector<8x32xf32>, vector<8x32xf32> -> vector<8x64xf32>
    %cst_173 = arith.constant dense<0.000000e+00> : vector<8x128xf32>
    %391 = tpu.matmul %390, %18, %cst_173 {dimension_numbers = #tpu.dot_dimension_numbers<[1], [0], [0], [1], [0, 0, 1, 1], [], []>} : vector<8x64xf32>, vector<64x128xf32>, vector<8x128xf32> -> vector<8x128xf32>
    %392 = vector.broadcast %19 : vector<1x128xf32> to vector<8x128xf32>
    %393 = arith.addf %391, %392 : vector<8x128xf32>
    %c0_174 = arith.constant 0 : index
    %c0_175 = arith.constant 0 : index
    %394 = vector.load %arg13[%c0_174, %c0_175] : memref<8x32xf32, #tpu.memory_space<vmem>>, vector<8x32xf32>
    %395 = vector.extract_strided_slice %393 {offsets = [0, 0], sizes = [8, 32], strides = [1, 1]} : vector<8x128xf32> to vector<8x32xf32>
    %396 = arith.negf %395 : vector<8x32xf32>
    %397 = math.exp %396 : vector<8x32xf32>
    %cst_176 = arith.constant 1.000000e+00 : f32
    %398 = vector.broadcast %cst_176 : f32 to vector<8x32xf32>
    %399 = arith.addf %398, %397 : vector<8x32xf32>
    %400 = arith.divf %398, %399 : vector<8x32xf32>
    %401 = vector.extract_strided_slice %393 {offsets = [0, 32], sizes = [8, 32], strides = [1, 1]} : vector<8x128xf32> to vector<8x32xf32>
    %402 = arith.negf %401 : vector<8x32xf32>
    %403 = math.exp %402 : vector<8x32xf32>
    %cst_177 = arith.constant 1.000000e+00 : f32
    %404 = vector.broadcast %cst_177 : f32 to vector<8x32xf32>
    %405 = arith.addf %404, %403 : vector<8x32xf32>
    %406 = arith.divf %404, %405 : vector<8x32xf32>
    %407 = vector.extract_strided_slice %393 {offsets = [0, 64], sizes = [8, 32], strides = [1, 1]} : vector<8x128xf32> to vector<8x32xf32>
    %408 = math.tanh %407 : vector<8x32xf32>
    %409 = vector.extract_strided_slice %393 {offsets = [0, 96], sizes = [8, 32], strides = [1, 1]} : vector<8x128xf32> to vector<8x32xf32>
    %410 = arith.negf %409 : vector<8x32xf32>
    %411 = math.exp %410 : vector<8x32xf32>
    %cst_178 = arith.constant 1.000000e+00 : f32
    %412 = vector.broadcast %cst_178 : f32 to vector<8x32xf32>
    %413 = arith.addf %412, %411 : vector<8x32xf32>
    %414 = arith.divf %412, %413 : vector<8x32xf32>
    %415 = arith.mulf %406, %394 : vector<8x32xf32>
    %416 = arith.mulf %400, %408 : vector<8x32xf32>
    %417 = arith.addf %415, %416 : vector<8x32xf32>
    %418 = math.tanh %417 : vector<8x32xf32>
    %419 = arith.mulf %414, %418 : vector<8x32xf32>
    %c0_179 = arith.constant 0 : index
    %c0_180 = arith.constant 0 : index
    %420 = vector.load %arg12[%c0_179, %c0_180] : memref<8x32xf32, #tpu.memory_space<vmem>>, vector<8x32xf32>
    tpu.vector_store %arg12[%c0_179, %c0_180], %419 {strides = array<i32>} : memref<8x32xf32, #tpu.memory_space<vmem>>, vector<8x32xf32>,
    %c0_181 = arith.constant 0 : index
    %c0_182 = arith.constant 0 : index
    %421 = vector.load %arg13[%c0_181, %c0_182] : memref<8x32xf32, #tpu.memory_space<vmem>>, vector<8x32xf32>
    tpu.vector_store %arg13[%c0_181, %c0_182], %417 {strides = array<i32>} : memref<8x32xf32, #tpu.memory_space<vmem>>, vector<8x32xf32>,
    %c6_i32 = arith.constant 6 : i32
    %422 = arith.index_cast %c6_i32 : i32 to index
    %c0_183 = arith.constant 0 : index
    %c0_184 = arith.constant 0 : index
    %423 = vector.load %arg9[%422, %c0_183, %c0_184] : memref<8x8x128xf32, #tpu.memory_space<vmem>>, vector<1x8x128xf32>
    %424 = vector.shape_cast %423 : vector<1x8x128xf32> to vector<8x128xf32>
    %c0_185 = arith.constant 0 : index
    %c0_186 = arith.constant 0 : index
    %425 = vector.load %arg10[%c0_185, %c0_186] : memref<8x32xf32, #tpu.memory_space<vmem>>, vector<8x32xf32>
    %cst_187 = arith.constant dense<0.000000e+00> : vector<8x128xf32>
    %426 = tpu.matmul %425, %17, %cst_187 {dimension_numbers = #tpu.dot_dimension_numbers<[1], [0], [0], [1], [0, 0, 1, 1], [], []>} : vector<8x32xf32>, vector<32x128xf32>, vector<8x128xf32> -> vector<8x128xf32>
    %427 = arith.addf %424, %426 : vector<8x128xf32>
    %c0_188 = arith.constant 0 : index
    %c0_189 = arith.constant 0 : index
    %428 = vector.load %arg11[%c0_188, %c0_189] : memref<8x32xf32, #tpu.memory_space<vmem>>, vector<8x32xf32>
    %429 = vector.extract_strided_slice %427 {offsets = [0, 0], sizes = [8, 32], strides = [1, 1]} : vector<8x128xf32> to vector<8x32xf32>
    %430 = arith.negf %429 : vector<8x32xf32>
    %431 = math.exp %430 : vector<8x32xf32>
    %cst_190 = arith.constant 1.000000e+00 : f32
    %432 = vector.broadcast %cst_190 : f32 to vector<8x32xf32>
    %433 = arith.addf %432, %431 : vector<8x32xf32>
    %434 = arith.divf %432, %433 : vector<8x32xf32>
    %435 = vector.extract_strided_slice %427 {offsets = [0, 32], sizes = [8, 32], strides = [1, 1]} : vector<8x128xf32> to vector<8x32xf32>
    %436 = arith.negf %435 : vector<8x32xf32>
    %437 = math.exp %436 : vector<8x32xf32>
    %cst_191 = arith.constant 1.000000e+00 : f32
    %438 = vector.broadcast %cst_191 : f32 to vector<8x32xf32>
    %439 = arith.addf %438, %437 : vector<8x32xf32>
    %440 = arith.divf %438, %439 : vector<8x32xf32>
    %441 = vector.extract_strided_slice %427 {offsets = [0, 64], sizes = [8, 32], strides = [1, 1]} : vector<8x128xf32> to vector<8x32xf32>
    %442 = math.tanh %441 : vector<8x32xf32>
    %443 = vector.extract_strided_slice %427 {offsets = [0, 96], sizes = [8, 32], strides = [1, 1]} : vector<8x128xf32> to vector<8x32xf32>
    %444 = arith.negf %443 : vector<8x32xf32>
    %445 = math.exp %444 : vector<8x32xf32>
    %cst_192 = arith.constant 1.000000e+00 : f32
    %446 = vector.broadcast %cst_192 : f32 to vector<8x32xf32>
    %447 = arith.addf %446, %445 : vector<8x32xf32>
    %448 = arith.divf %446, %447 : vector<8x32xf32>
    %449 = arith.mulf %440, %428 : vector<8x32xf32>
    %450 = arith.mulf %434, %442 : vector<8x32xf32>
    %451 = arith.addf %449, %450 : vector<8x32xf32>
    %452 = math.tanh %451 : vector<8x32xf32>
    %453 = arith.mulf %448, %452 : vector<8x32xf32>
    %c0_193 = arith.constant 0 : index
    %c0_194 = arith.constant 0 : index
    %454 = vector.load %arg10[%c0_193, %c0_194] : memref<8x32xf32, #tpu.memory_space<vmem>>, vector<8x32xf32>
    tpu.vector_store %arg10[%c0_193, %c0_194], %453 {strides = array<i32>} : memref<8x32xf32, #tpu.memory_space<vmem>>, vector<8x32xf32>,
    %c0_195 = arith.constant 0 : index
    %c0_196 = arith.constant 0 : index
    %455 = vector.load %arg11[%c0_195, %c0_196] : memref<8x32xf32, #tpu.memory_space<vmem>>, vector<8x32xf32>
    tpu.vector_store %arg11[%c0_195, %c0_196], %451 {strides = array<i32>} : memref<8x32xf32, #tpu.memory_space<vmem>>, vector<8x32xf32>,
    %c0_197 = arith.constant 0 : index
    %c0_198 = arith.constant 0 : index
    %456 = vector.load %arg12[%c0_197, %c0_198] : memref<8x32xf32, #tpu.memory_space<vmem>>, vector<8x32xf32>
    %457 = tpu.concatenate %453, %456 in 1 : vector<8x32xf32>, vector<8x32xf32> -> vector<8x64xf32>
    %cst_199 = arith.constant dense<0.000000e+00> : vector<8x128xf32>
    %458 = tpu.matmul %457, %18, %cst_199 {dimension_numbers = #tpu.dot_dimension_numbers<[1], [0], [0], [1], [0, 0, 1, 1], [], []>} : vector<8x64xf32>, vector<64x128xf32>, vector<8x128xf32> -> vector<8x128xf32>
    %459 = vector.broadcast %19 : vector<1x128xf32> to vector<8x128xf32>
    %460 = arith.addf %458, %459 : vector<8x128xf32>
    %c0_200 = arith.constant 0 : index
    %c0_201 = arith.constant 0 : index
    %461 = vector.load %arg13[%c0_200, %c0_201] : memref<8x32xf32, #tpu.memory_space<vmem>>, vector<8x32xf32>
    %462 = vector.extract_strided_slice %460 {offsets = [0, 0], sizes = [8, 32], strides = [1, 1]} : vector<8x128xf32> to vector<8x32xf32>
    %463 = arith.negf %462 : vector<8x32xf32>
    %464 = math.exp %463 : vector<8x32xf32>
    %cst_202 = arith.constant 1.000000e+00 : f32
    %465 = vector.broadcast %cst_202 : f32 to vector<8x32xf32>
    %466 = arith.addf %465, %464 : vector<8x32xf32>
    %467 = arith.divf %465, %466 : vector<8x32xf32>
    %468 = vector.extract_strided_slice %460 {offsets = [0, 32], sizes = [8, 32], strides = [1, 1]} : vector<8x128xf32> to vector<8x32xf32>
    %469 = arith.negf %468 : vector<8x32xf32>
    %470 = math.exp %469 : vector<8x32xf32>
    %cst_203 = arith.constant 1.000000e+00 : f32
    %471 = vector.broadcast %cst_203 : f32 to vector<8x32xf32>
    %472 = arith.addf %471, %470 : vector<8x32xf32>
    %473 = arith.divf %471, %472 : vector<8x32xf32>
    %474 = vector.extract_strided_slice %460 {offsets = [0, 64], sizes = [8, 32], strides = [1, 1]} : vector<8x128xf32> to vector<8x32xf32>
    %475 = math.tanh %474 : vector<8x32xf32>
    %476 = vector.extract_strided_slice %460 {offsets = [0, 96], sizes = [8, 32], strides = [1, 1]} : vector<8x128xf32> to vector<8x32xf32>
    %477 = arith.negf %476 : vector<8x32xf32>
    %478 = math.exp %477 : vector<8x32xf32>
    %cst_204 = arith.constant 1.000000e+00 : f32
    %479 = vector.broadcast %cst_204 : f32 to vector<8x32xf32>
    %480 = arith.addf %479, %478 : vector<8x32xf32>
    %481 = arith.divf %479, %480 : vector<8x32xf32>
    %482 = arith.mulf %473, %461 : vector<8x32xf32>
    %483 = arith.mulf %467, %475 : vector<8x32xf32>
    %484 = arith.addf %482, %483 : vector<8x32xf32>
    %485 = math.tanh %484 : vector<8x32xf32>
    %486 = arith.mulf %481, %485 : vector<8x32xf32>
    %c0_205 = arith.constant 0 : index
    %c0_206 = arith.constant 0 : index
    %487 = vector.load %arg12[%c0_205, %c0_206] : memref<8x32xf32, #tpu.memory_space<vmem>>, vector<8x32xf32>
    tpu.vector_store %arg12[%c0_205, %c0_206], %486 {strides = array<i32>} : memref<8x32xf32, #tpu.memory_space<vmem>>, vector<8x32xf32>,
    %c0_207 = arith.constant 0 : index
    %c0_208 = arith.constant 0 : index
    %488 = vector.load %arg13[%c0_207, %c0_208] : memref<8x32xf32, #tpu.memory_space<vmem>>, vector<8x32xf32>
    tpu.vector_store %arg13[%c0_207, %c0_208], %484 {strides = array<i32>} : memref<8x32xf32, #tpu.memory_space<vmem>>, vector<8x32xf32>,
    %c7_i32 = arith.constant 7 : i32
    %489 = arith.index_cast %c7_i32 : i32 to index
    %c0_209 = arith.constant 0 : index
    %c0_210 = arith.constant 0 : index
    %490 = vector.load %arg9[%489, %c0_209, %c0_210] : memref<8x8x128xf32, #tpu.memory_space<vmem>>, vector<1x8x128xf32>
    %491 = vector.shape_cast %490 : vector<1x8x128xf32> to vector<8x128xf32>
    %c0_211 = arith.constant 0 : index
    %c0_212 = arith.constant 0 : index
    %492 = vector.load %arg10[%c0_211, %c0_212] : memref<8x32xf32, #tpu.memory_space<vmem>>, vector<8x32xf32>
    %cst_213 = arith.constant dense<0.000000e+00> : vector<8x128xf32>
    %493 = tpu.matmul %492, %17, %cst_213 {dimension_numbers = #tpu.dot_dimension_numbers<[1], [0], [0], [1], [0, 0, 1, 1], [], []>} : vector<8x32xf32>, vector<32x128xf32>, vector<8x128xf32> -> vector<8x128xf32>
    %494 = arith.addf %491, %493 : vector<8x128xf32>
    %c0_214 = arith.constant 0 : index
    %c0_215 = arith.constant 0 : index
    %495 = vector.load %arg11[%c0_214, %c0_215] : memref<8x32xf32, #tpu.memory_space<vmem>>, vector<8x32xf32>
    %496 = vector.extract_strided_slice %494 {offsets = [0, 0], sizes = [8, 32], strides = [1, 1]} : vector<8x128xf32> to vector<8x32xf32>
    %497 = arith.negf %496 : vector<8x32xf32>
    %498 = math.exp %497 : vector<8x32xf32>
    %cst_216 = arith.constant 1.000000e+00 : f32
    %499 = vector.broadcast %cst_216 : f32 to vector<8x32xf32>
    %500 = arith.addf %499, %498 : vector<8x32xf32>
    %501 = arith.divf %499, %500 : vector<8x32xf32>
    %502 = vector.extract_strided_slice %494 {offsets = [0, 32], sizes = [8, 32], strides = [1, 1]} : vector<8x128xf32> to vector<8x32xf32>
    %503 = arith.negf %502 : vector<8x32xf32>
    %504 = math.exp %503 : vector<8x32xf32>
    %cst_217 = arith.constant 1.000000e+00 : f32
    %505 = vector.broadcast %cst_217 : f32 to vector<8x32xf32>
    %506 = arith.addf %505, %504 : vector<8x32xf32>
    %507 = arith.divf %505, %506 : vector<8x32xf32>
    %508 = vector.extract_strided_slice %494 {offsets = [0, 64], sizes = [8, 32], strides = [1, 1]} : vector<8x128xf32> to vector<8x32xf32>
    %509 = math.tanh %508 : vector<8x32xf32>
    %510 = vector.extract_strided_slice %494 {offsets = [0, 96], sizes = [8, 32], strides = [1, 1]} : vector<8x128xf32> to vector<8x32xf32>
    %511 = arith.negf %510 : vector<8x32xf32>
    %512 = math.exp %511 : vector<8x32xf32>
    %cst_218 = arith.constant 1.000000e+00 : f32
    %513 = vector.broadcast %cst_218 : f32 to vector<8x32xf32>
    %514 = arith.addf %513, %512 : vector<8x32xf32>
    %515 = arith.divf %513, %514 : vector<8x32xf32>
    %516 = arith.mulf %507, %495 : vector<8x32xf32>
    %517 = arith.mulf %501, %509 : vector<8x32xf32>
    %518 = arith.addf %516, %517 : vector<8x32xf32>
    %519 = math.tanh %518 : vector<8x32xf32>
    %520 = arith.mulf %515, %519 : vector<8x32xf32>
    %c0_219 = arith.constant 0 : index
    %c0_220 = arith.constant 0 : index
    %521 = vector.load %arg10[%c0_219, %c0_220] : memref<8x32xf32, #tpu.memory_space<vmem>>, vector<8x32xf32>
    tpu.vector_store %arg10[%c0_219, %c0_220], %520 {strides = array<i32>} : memref<8x32xf32, #tpu.memory_space<vmem>>, vector<8x32xf32>,
    %c0_221 = arith.constant 0 : index
    %c0_222 = arith.constant 0 : index
    %522 = vector.load %arg11[%c0_221, %c0_222] : memref<8x32xf32, #tpu.memory_space<vmem>>, vector<8x32xf32>
    tpu.vector_store %arg11[%c0_221, %c0_222], %518 {strides = array<i32>} : memref<8x32xf32, #tpu.memory_space<vmem>>, vector<8x32xf32>,
    %c0_223 = arith.constant 0 : index
    %c0_224 = arith.constant 0 : index
    %523 = vector.load %arg12[%c0_223, %c0_224] : memref<8x32xf32, #tpu.memory_space<vmem>>, vector<8x32xf32>
    %524 = tpu.concatenate %520, %523 in 1 : vector<8x32xf32>, vector<8x32xf32> -> vector<8x64xf32>
    %cst_225 = arith.constant dense<0.000000e+00> : vector<8x128xf32>
    %525 = tpu.matmul %524, %18, %cst_225 {dimension_numbers = #tpu.dot_dimension_numbers<[1], [0], [0], [1], [0, 0, 1, 1], [], []>} : vector<8x64xf32>, vector<64x128xf32>, vector<8x128xf32> -> vector<8x128xf32>
    %526 = vector.broadcast %19 : vector<1x128xf32> to vector<8x128xf32>
    %527 = arith.addf %525, %526 : vector<8x128xf32>
    %c0_226 = arith.constant 0 : index
    %c0_227 = arith.constant 0 : index
    %528 = vector.load %arg13[%c0_226, %c0_227] : memref<8x32xf32, #tpu.memory_space<vmem>>, vector<8x32xf32>
    %529 = vector.extract_strided_slice %527 {offsets = [0, 0], sizes = [8, 32], strides = [1, 1]} : vector<8x128xf32> to vector<8x32xf32>
    %530 = arith.negf %529 : vector<8x32xf32>
    %531 = math.exp %530 : vector<8x32xf32>
    %cst_228 = arith.constant 1.000000e+00 : f32
    %532 = vector.broadcast %cst_228 : f32 to vector<8x32xf32>
    %533 = arith.addf %532, %531 : vector<8x32xf32>
    %534 = arith.divf %532, %533 : vector<8x32xf32>
    %535 = vector.extract_strided_slice %527 {offsets = [0, 32], sizes = [8, 32], strides = [1, 1]} : vector<8x128xf32> to vector<8x32xf32>
    %536 = arith.negf %535 : vector<8x32xf32>
    %537 = math.exp %536 : vector<8x32xf32>
    %cst_229 = arith.constant 1.000000e+00 : f32
    %538 = vector.broadcast %cst_229 : f32 to vector<8x32xf32>
    %539 = arith.addf %538, %537 : vector<8x32xf32>
    %540 = arith.divf %538, %539 : vector<8x32xf32>
    %541 = vector.extract_strided_slice %527 {offsets = [0, 64], sizes = [8, 32], strides = [1, 1]} : vector<8x128xf32> to vector<8x32xf32>
    %542 = math.tanh %541 : vector<8x32xf32>
    %543 = vector.extract_strided_slice %527 {offsets = [0, 96], sizes = [8, 32], strides = [1, 1]} : vector<8x128xf32> to vector<8x32xf32>
    %544 = arith.negf %543 : vector<8x32xf32>
    %545 = math.exp %544 : vector<8x32xf32>
    %cst_230 = arith.constant 1.000000e+00 : f32
    %546 = vector.broadcast %cst_230 : f32 to vector<8x32xf32>
    %547 = arith.addf %546, %545 : vector<8x32xf32>
    %548 = arith.divf %546, %547 : vector<8x32xf32>
    %549 = arith.mulf %540, %528 : vector<8x32xf32>
    %550 = arith.mulf %534, %542 : vector<8x32xf32>
    %551 = arith.addf %549, %550 : vector<8x32xf32>
    %552 = math.tanh %551 : vector<8x32xf32>
    %553 = arith.mulf %548, %552 : vector<8x32xf32>
    %c0_231 = arith.constant 0 : index
    %c0_232 = arith.constant 0 : index
    %554 = vector.load %arg12[%c0_231, %c0_232] : memref<8x32xf32, #tpu.memory_space<vmem>>, vector<8x32xf32>
    tpu.vector_store %arg12[%c0_231, %c0_232], %553 {strides = array<i32>} : memref<8x32xf32, #tpu.memory_space<vmem>>, vector<8x32xf32>,
    %c0_233 = arith.constant 0 : index
    %c0_234 = arith.constant 0 : index
    %555 = vector.load %arg13[%c0_233, %c0_234] : memref<8x32xf32, #tpu.memory_space<vmem>>, vector<8x32xf32>
    tpu.vector_store %arg13[%c0_233, %c0_234], %551 {strides = array<i32>} : memref<8x32xf32, #tpu.memory_space<vmem>>, vector<8x32xf32>,
    %c8_i32 = arith.constant 8 : i32
    %c0_235 = arith.constant 0 : index
    %c0_236 = arith.constant 0 : index
    %556 = vector.load %arg12[%c0_235, %c0_236] : memref<8x32xf32, #tpu.memory_space<vmem>>, vector<8x32xf32>
    %c0_237 = arith.constant 0 : index
    %c0_238 = arith.constant 0 : index
    %557 = vector.load %arg6[%c0_237, %c0_238] : memref<32x2xf32, #tpu.memory_space<vmem>>, vector<32x2xf32>
    %cst_239 = arith.constant dense<0.000000e+00> : vector<8x2xf32>
    %558 = tpu.matmul %556, %557, %cst_239 {dimension_numbers = #tpu.dot_dimension_numbers<[1], [0], [0], [1], [0, 0, 1, 1], [], []>} : vector<8x32xf32>, vector<32x2xf32>, vector<8x2xf32> -> vector<8x2xf32>
    %c0_240 = arith.constant 0 : index
    %c0_241 = arith.constant 0 : index
    %559 = vector.load %arg7[%c0_240, %c0_241] : memref<1x2xf32, #tpu.memory_space<vmem>>, vector<1x2xf32>
    %560 = vector.broadcast %559 : vector<1x2xf32> to vector<8x2xf32>
    %561 = arith.addf %558, %560 : vector<8x2xf32>
    %cst_242 = arith.constant dense<0xFF800000> : vector<8xf32>
    %562 = vector.multi_reduction <maximumf>, %561, %cst_242 [1] : vector<8x2xf32> to vector<8xf32>
    %563 = vector.shape_cast %562 : vector<8xf32> to vector<8x1xf32>
    %564 = vector.broadcast %563 : vector<8x1xf32> to vector<8x2xf32>
    %565 = arith.subf %561, %564 : vector<8x2xf32>
    %566 = math.exp %565 : vector<8x2xf32>
    %cst_243 = arith.constant dense<0.000000e+00> : vector<8xf32>
    %567 = vector.multi_reduction <add>, %566, %cst_243 [1] : vector<8x2xf32> to vector<8xf32>
    %568 = vector.shape_cast %567 : vector<8xf32> to vector<8x1xf32>
    %569 = tpu.reciprocal %568 {approx = true} : vector<8x1xf32> -> vector<8x1xf32>
    %570 = vector.broadcast %569 : vector<8x1xf32> to vector<8x2xf32>
    %571 = arith.mulf %566, %570 : vector<8x2xf32>
    %c0_244 = arith.constant 0 : index
    %c0_245 = arith.constant 0 : index
    %572 = vector.load %arg8[%c0_244, %c0_245] : memref<8x2xf32, #tpu.memory_space<vmem>>, vector<8x2xf32>
    tpu.vector_store %arg8[%c0_244, %c0_245], %571 {strides = array<i32>} : memref<8x2xf32, #tpu.memory_space<vmem>>, vector<8x2xf32>,
    return
  }
}

</mosaic_0001>

<bundles_post_ra>
// kernel: tpu_custom_call.1
= control target key start
LH: loop header
LB: loop body
LE: loop exit
PB: predicated region body
PF: predicated region fallthrough
CT: control target
= control target key end

     0   :  { %13 = vsyncpa [#allocation8], 0  ;;  %s3503_s0 = inlined_call_operand.hbm [shape: f32[8,8,32], index: 0, kind: input, shape index: {}]   ;;  %s3504_s1 = inlined_call_operand.vmem [shape: f32[32,128], index: 1, kind: input, shape index: {}]   ;;  %s3505_s2 = inlined_call_operand.hbm [shape: f32[32,128], index: 2, kind: input, shape index: {}]   ;;  %s3506_s3 = inlined_call_operand.vmem [shape: f32[1,128], index: 3, kind: input, shape index: {}]   ;;  %s3507_s4 = inlined_call_operand.hbm [shape: f32[64,128], index: 4, kind: input, shape index: {}]   ;;  %s3508_s5 = inlined_call_operand.vmem [shape: f32[1,128], index: 5, kind: input, shape index: {}]   ;;  %s3509_s6 = inlined_call_operand.vmem [shape: f32[32,2], index: 6, kind: input, shape index: {}]   ;;  %s3510_s7 = inlined_call_operand.vmem [shape: f32[1,2], index: 7, kind: input, shape index: {}]   ;;  %s3511_s8 = inlined_call_operand.vmem [shape: f32[8,2], index: 8, kind: output, shape index: {}]  }
   0x1   :  { %14 = vsyncpa [#allocation10], 0  ;;  %s2890_s27 = smov [#allocation9]   ;;  %s2891_s29 = smov [#allocation7]  }
   0x2   :  { %s34_s28 = sshll.u32 %s2890_s27, 4  ;;  %s20_s30 = sshll.u32 %s2891_s29, 4  ;;  %s35_s28 = int_to_ptr.vmem [resolvable:$true] %s34_s28  ;;  %s21_s30 = int_to_ptr.vmem [resolvable:$true] %s20_s30 }
   0x3   :  { %s2834_s9 = scalar_lea.vmem %s35_s28, 512  ;;  %p2839_p1 = scmp.lt.s32.totalorder %s35_s28, %s35_s28 }
   0x4   :  { %p2835_p0 = scmp.ne.s32.totalorder %s35_s28, %s2834_s9  ;;  %p2840_p2 = scmp.lt.s32.totalorder %s2834_s9, %s2834_s9 }
   0x6   :  { %p2841_p3 = por %p2840_p2, %p2839_p1 }
   0x8   :  { %p2842_p4 = pnand %p2841_p3, %p2835_p0 }
   0xa   :  { %2845 = shalt.err (!%p2842_p4)
}
   0xb   :  { %s2892_s10 = smov 128   ;;  %s2893_s11 = smov 8  }
   0xc   :  { %40 = dma.hbm_to_vmem [thread:$0]  %s3505_s2, 512, %s35_s28, [#allocation10], %s2892_s10, %s2892_s10, %s2893_s11  }
   0xd   :  { %s2854_s14 = scalar_lea.vmem %s21_s30, 1024  ;;  %p2859_p6 = scmp.lt.s32.totalorder %s21_s30, %s21_s30 }
   0xe   :  { %p2855_p5 = scmp.ne.s32.totalorder %s21_s30, %s2854_s14  ;;  %p2860_p7 = scmp.lt.s32.totalorder %s2854_s14, %s2854_s14 }
  0x10   :  { %p2861_p8 = por %p2860_p7, %p2859_p6 }
  0x12   :  { %p2862_p9 = pnand %p2861_p8, %p2855_p5 }
  0x14   :  { %2865 = shalt.err (!%p2862_p9)
}
  0x15   :  { %26 = dma.hbm_to_vmem [thread:$0]  %s3503_s0, 1024, %s21_s30, [#allocation8], %s2892_s10, %s2892_s10, %s2893_s11  }
  0x16   :  { %s2894_s17 = smov [#allocation11]  }
  0x17   :  { %s48_s18 = sshll.u32 %s2894_s17, 4  ;;  %s49_s18 = int_to_ptr.vmem [resolvable:$true] %s48_s18 }
  0x18   :  { %s2874_s19 = scalar_lea.vmem %s49_s18, 1024  ;;  %p2879_p11 = scmp.lt.s32.totalorder %s49_s18, %s49_s18 }
  0x19   :  { %p2875_p10 = scmp.ne.s32.totalorder %s49_s18, %s2874_s19  ;;  %p2880_p12 = scmp.lt.s32.totalorder %s2874_s19, %s2874_s19 }
  0x1b   :  { %p2881_p13 = por %p2880_p12, %p2879_p11 }
  0x1d   :  { %p2882_p0 = pnand %p2881_p13, %p2875_p10 }
  0x1f   :  { %2885 = shalt.err (!%p2882_p0)
}
  0x20   :  { %54 = dma.hbm_to_vmem [thread:$0]  %s3507_s4, 1024, %s49_s18, [#allocation10], %s2892_s10, %s2892_s10, %s2893_s11  }
  0x21   :  { %2886 = dma.done.wait [#allocation8], 1024  }
  0x22   :  { %2887 = vsyncadd [#allocation8], 4294966272 }
  0x23   :  { %2888 = dma.done.wait [#allocation10], 1536  }
  0x24   :  { %2889 = vsyncadd [#allocation10], 4294965760  ;;  %vm89_vm0 = vcmask 261120   ;;  %v2895_v0 = vmov 0.0   ;;  %vm2896_vm1 = vmmov 0   ;;  %v81_v1 = vld [vmem:[%s3504_s1 + $0x18] sm:$0xff] }
  0x25   :  { %2419 = vmatprep.subr.mxu1 %v2895_v0  ;;  %227 = vst.msk [vmem:[#allocation3] sm:$0xff] %vm89_vm0, %v2895_v0  ;;  %228 = vst.msk [vmem:[#allocation4] sm:$0xff] %vm89_vm0, %v2895_v0  ;;  %2427 = vmatprep.mubr.msk.f32.mxu1 %vm2896_vm1, %v2895_v0  ;;  %v80_v2 = vld [vmem:[%s3504_s1 + $0x10] sm:$0xff]  ;;  %v2971_v3 = vld [vmem:[#allocation9 + $0x18] sm:$0xff]  ;;  %s2897_s28 = smov 64   ;;  %s2898_s29 = smov 32  }
  0x26   :  { %229 = vst.msk [vmem:[#allocation5] sm:$0xff] %vm89_vm0, %v2895_v0  ;;  %230 = vst.msk [vmem:[#allocation6] sm:$0xff] %vm89_vm0, %v2895_v0  ;;  %2399 = vmatprep.subr.mxu0 %v81_v1  ;;  %2420 = vmatpush3.msra.mxu1 %v2971_v3  ;;  %v2974_v4 = vld [vmem:[#allocation9 + $0x10] sm:$0xff]  ;;  %v79_v5 = vld [vmem:[%s3504_s1 + $0x8] sm:$0xff]  ;;  %s2899_s30 = smov 96   ;;  %vm371_vm2 = vcmask 523264  }
  0x27   :  { %2400 = vmatpush3.msra.mxu0 %v81_v1  ;;  %2421 = vmatprep.subr.mxu1 %v2895_v0  ;;  %v70_v6 = vld [vmem:[#allocation7] sm:$0xff]  ;;  %v2981_v7 = vld [vmem:[#allocation9 + $0x8] sm:$0xff]  ;;  %v3018_v31 = vld [vmem:[#allocation11 + $0x38] sm:$0xff]  ;;  %vm2207_vm3 = vcmask 15360  }
  0x28   :  { %2401 = vmatprep.subr.mxu0 %v80_v2  ;;  %2422 = vmatpush3.msra.mxu1 %v2974_v4  ;;  %v78_v8 = vld [vmem:[%s3504_s1] sm:$0xff]  ;;  %v71_v10 = vld [vmem:[#allocation7 + $0x8] sm:$0xff]  ;;  %v72_v32 = vld [vmem:[#allocation7 + $0x10] sm:$0xff] }
  0x29   :  { %2402 = vmatpush3.msra.mxu0 %v80_v2  ;;  %2423 = vmatprep.subr.mxu1 %v2895_v0  ;;  %v2988_v9 = vld [vmem:[#allocation9] sm:$0xff]  ;;  %v73_v33 = vld [vmem:[#allocation7 + $0x18] sm:$0xff]  ;;  %v3022_v34 = vld [vmem:[#allocation11 + $0x30] sm:$0xff] }
  0x2a   :  { %2403 = vmatprep.subr.mxu0 %v79_v5  ;;  %2407 = vmatprep.mubr.msk.f32.mxu0 %vm89_vm0, %v70_v6  ;;  %v3012_v14 = vld [vmem:[%s3506_s3] ss:$0 sm:$0xff]  ;;  %v3026_v36 = vld [vmem:[#allocation11 + $0x28] sm:$0xff]  ;;  %v76_v40 = vld [vmem:[#allocation7 + $0x30] sm:$0xff] }
  0x2b   :  { %2404 = vmatpush3.msra.mxu0 %v79_v5  ;;  %2424 = vmatpush3.msra.mxu1 %v2981_v7  ;;  %v74_v35 = vld [vmem:[#allocation7 + $0x20] sm:$0xff]  ;;  %v75_v37 = vld [vmem:[#allocation7 + $0x28] sm:$0xff]  ;;  %v3037_v42 = vld [vmem:[#allocation11 + $0x18] sm:$0xff] }
  0x2c   :  { %v245_v11 = vld [vmem:[#allocation3] sm:$0xff]  ;;  %2405 = vmatprep.subr.mxu0 %v78_v8  ;;  %2425 = vmatprep.subr.mxu1 %v2895_v0  ;;  %v320_v20 = vld [vmem:[#allocation4] sm:$0xff]  ;;  %v77_v43 = vld [vmem:[#allocation7 + $0x38] sm:$0xff] }
  0x2d   :  { %2406 = vmatpush3.msra.mxu0 %v78_v8  ;;  %2426 = vmatpush3.msra.mxu1 %v2988_v9  ;;  %v3031_v39 = vld [vmem:[#allocation11 + $0x20] sm:$0xff]  ;;  %v359_v41 = vld [vmem:[#allocation5] sm:$0xff]  ;;  %v3048_v45 = vld [vmem:[#allocation11 + $0x8] sm:$0xff] }
  0x2e   :  { %2408 = vmatmul.mubr.msk.f32.vlgmr.msra.gmra.mxu0 %vm89_vm0, %v71_v10  ;;  %2428 = vmatmul.mubr.msk.f32.vlgmr.msra.gmra.mxu1 %vm89_vm0, %v245_v11  ;;  %v3042_v44 = vld [vmem:[#allocation11 + $0x10] sm:$0xff]  ;;  %v3054_v46 = vld [vmem:[#allocation11] sm:$0xff]  ;;  %v445_v10 = vld [vmem:[#allocation6] sm:$0xff] }
  0x2f   :  { %2430 = vmatprep.subr.mxu0 %v2895_v0  ;;  %2449 = vmatprep.subr.mxu1 %v2895_v0  ;;  %v3110_v60 = vld [vmem:[%s3508_s5] ss:$0 sm:$0xff] }
  0x30   :  { %2450 = vmatpush3.msra.mxu1 %v2971_v3  ;;  %2457 = vmatprep.mubr.msk.f32.mxu1 %vm2896_vm1, %v2895_v0 }
  0x31   :  { %2451 = vmatprep.subr.mxu1 %v2895_v0  ;;  %2431 = vmatpush3.msra.mxu0 %v3018_v31 }
  0x32   :  { %2452 = vmatpush3.msra.mxu1 %v2974_v4  ;;  %2410 = vmatprep.mubr.msk.f32.mxu0 %vm89_vm0, %v72_v32 }
  0x33   :  { %2453 = vmatprep.subr.mxu1 %v2895_v0  ;;  %2432 = vmatprep.subr.mxu0 %v2895_v0 }
  0x34   :  { %2454 = vmatpush3.msra.mxu1 %v2981_v7  ;;  %2411 = vmatmul.mubr.msk.f32.gmra.mxu0 %vm89_vm0, %v73_v33 }
  0x35   :  { %2455 = vmatprep.subr.mxu1 %v2895_v0  ;;  %2433 = vmatpush3.msra.mxu0 %v3022_v34 }
  0x36   :  { %2456 = vmatpush3.msra.mxu1 %v2988_v9  ;;  %2413 = vmatprep.mubr.msk.f32.mxu0 %vm89_vm0, %v74_v35 }
  0x37   :  { %2460 = vmatprep.subr.mxu1 %v2895_v0  ;;  %2434 = vmatprep.subr.mxu0 %v2895_v0 }
  0x38   :  { %2435 = vmatpush3.msra.mxu0 %v3026_v36 }
  0x39   :  { %2436 = vmatprep.subr.mxu0 %v2895_v0  ;;  %2414 = vmatmul.mubr.msk.f32.gmra.mxu0 %vm89_vm0, %v75_v37 }
  0x3a   :  { %2437 = vmatpush3.msra.mxu0 %v3031_v39  ;;  %2416 = vmatprep.mubr.msk.f32.mxu0 %vm89_vm0, %v76_v40 }
  0x3b   :  { %2438 = vmatprep.subr.mxu0 %v2895_v0 }
  0x3c   :  { %2439 = vmatpush3.msra.mxu0 %v3037_v42 }
  0x3d   :  { %2440 = vmatprep.subr.mxu0 %v2895_v0  ;;  %2417 = vmatmul.mubr.msk.f32.gmra.mxu0 %vm89_vm0, %v77_v43 }
  0x3e   :  { %2441 = vmatpush3.msra.mxu0 %v3042_v44  ;;  %2446 = vmatprep.mubr.msk.f32.mxu0 %vm2896_vm1, %v2895_v0 }
  0x3f   :  { %2442 = vmatprep.subr.mxu0 %v2895_v0 }
  0x40   :  { %2443 = vmatpush3.msra.mxu0 %v3048_v45 }
  0x41   :  { %2444 = vmatprep.subr.mxu0 %v2895_v0 }
  0x42   :  { %2445 = vmatpush3.msra.mxu0 %v3054_v46 }
  0x43   :  { %2479 = vmatprep.subr.mxu0 %v2895_v0 }
  0xee   :  { %v3007_v12 = vpop.f32.mrf.mxu0  ;;  %v315_v13 = vpop.f32.mrf.mxu1 }
  0xef   :  { %v186_v1 = vadd.f32 %v3007_v12, %v3012_v14 }
  0xf0   :  { %v180_v15 = vpop.f32.mrf.mxu0  ;;  %v2429_v16 = vpop.f32.mrf.mxu1 }
  0xf1   :  { %v181_v17 = vadd.f32 %v3012_v14, %v180_v15 }
  0xf3   :  { %v319_v18 = vadd.f32 %v315_v13, %v181_v17 }
  0xf4   :  { %v3095_v54 = vpop.f32.mrf.mxu0 }
  0xf5   :  { %2680 = vtanh.f32 %v319_v18  ;;  %v2236_v21 = vmul.f32 -1.442695, %v319_v18 }
  0xf6   :  { %v3097_v55 = vpop.f32.mrf.mxu0 }
  0xf7   :  { %2682 = vpow2.f32 %v2236_v21 }
  0xf9   :  { %v3099_v56 = vpop.f32.mrf.mxu0 }
  0xfb   :  { %v3101_v57 = vpop.f32.mrf.mxu0 }
  0xfd   :  { %v3103_v58 = vpop.f32.mrf.mxu0 }
  0xff   :  { %v3105_v59 = vpop.f32.mrf.mxu0 }
 0x102   :  { %v2681_v19 = vpop.eup %2680 }
 0x103   :  { %334 = vrot.lane.b32.xlu0 %v2681_v19, %s2897_s28 }
 0x104   :  { %v2683_v22 = vpop.eup %2682 }
 0x105   :  { %v324_v23 = vadd.f32 1.0, %v2683_v22 }
 0x107   :  { %329 = vrot.lane.b32.xlu0 %v320_v20, %s2898_s29  ;;  %2684 = vrcp.f32 %v324_v23 }
 0x114   :  { %v2685_v24 = vpop.eup %2684 }
 0x175   :  { %v335_v25 = vpop.permute.xlu0 %334 }
 0x176   :  { %v337_v26 = vmul.f32 %v2685_v24, %v335_v25 }
 0x178   :  { %339 = vrot.lane.b32.xlu1 %v337_v26, %s2898_s29 }
 0x179   :  { %v330_v27 = vpop.permute.xlu0 %329 }
 0x17a   :  { %v332_v28 = vmul.f32 %v2685_v24, %v330_v27 }
 0x1ea   :  { %v340_v29 = vpop.permute.xlu1 %339 }
 0x1eb   :  { %v342_v30 = vadd.f32 %v340_v29, %v332_v28 }
 0x1ed   :  { %2686 = vtanh.f32 %v342_v30 }
 0x1fa   :  { %v2687_v38 = vpop.eup %2686 }
 0x1fb   :  { %345 = vrot.lane.b32.xlu1 %v2687_v38, %s2897_s28 }
 0x1ff   :  { %361 = vrot.lane.b32.xlu1 %v359_v41, %s2898_s29 }
 0x203   :  { %355 = vrot.lane.b32.xlu1 %v342_v30, %s2899_s30 }
 0x26d   :  { %v346_v47 = vpop.permute.xlu1 %345 }
 0x26e   :  { %v348_v48 = vmul.f32 %v2685_v24, %v346_v47 }
 0x270   :  { %350 = vrot.lane.b32.xlu0 %v348_v48, %s2898_s29 }
 0x271   :  { %v362_v49 = vpop.permute.xlu1 %361 }
 0x275   :  { %v356_v50 = vpop.permute.xlu1 %355 }
 0x276   :  { %358 = vst.msk [vmem:[#allocation4] sm:$0xff] %vm89_vm0, %v356_v50 }
 0x27d   :  { %v561_v23 = vld [vmem:[#allocation4] sm:$0xff] }
 0x2e2   :  { %v351_v51 = vpop.permute.xlu0 %350 }
 0x2e3   :  { %353 = vst.msk [vmem:[#allocation3] sm:$0xff] %vm89_vm0, %v351_v51  ;;  %v364_v52 = vsel %vm89_vm0, %v351_v51, %v362_v49 }
 0x2e4   :  { %2447 = vmatmul.mubr.msk.f32.vlgmr.msra.gmra.mxu0 %vm371_vm2, %v364_v52 }
 0x2e5   :  { %2480 = vmatpush3.msra.mxu0 %v2971_v3  ;;  %2487 = vmatprep.mubr.msk.f32.mxu0 %vm2896_vm1, %v2895_v0 }
 0x2e6   :  { %2481 = vmatprep.subr.mxu0 %v2895_v0 }
 0x2e7   :  { %2482 = vmatpush3.msra.mxu0 %v2974_v4 }
 0x2e8   :  { %2483 = vmatprep.subr.mxu0 %v2895_v0 }
 0x2e9   :  { %2484 = vmatpush3.msra.mxu0 %v2981_v7 }
 0x2ea   :  { %v486_v53 = vld [vmem:[#allocation3] sm:$0xff]  ;;  %2485 = vmatprep.subr.mxu0 %v2895_v0 }
 0x2eb   :  { %2458 = vmatmul.mubr.msk.f32.vlgmr.msra.gmra.mxu1 %vm89_vm0, %v486_v53  ;;  %2486 = vmatpush3.msra.mxu0 %v2988_v9 }
 0x2ec   :  { %2461 = vmatpush3.msra.mxu1 %v3018_v31  ;;  %2476 = vmatprep.mubr.msk.f32.mxu1 %vm2896_vm1, %v2895_v0 }
 0x2ed   :  { %2462 = vmatprep.subr.mxu1 %v2895_v0  ;;  %2490 = vmatprep.subr.mxu0 %v2895_v0 }
 0x2ee   :  { %2463 = vmatpush3.msra.mxu1 %v3022_v34 }
 0x2ef   :  { %2464 = vmatprep.subr.mxu1 %v2895_v0 }
 0x2f0   :  { %2465 = vmatpush3.msra.mxu1 %v3026_v36 }
 0x2f1   :  { %2466 = vmatprep.subr.mxu1 %v2895_v0 }
 0x2f2   :  { %2467 = vmatpush3.msra.mxu1 %v3031_v39 }
 0x2f3   :  { %2468 = vmatprep.subr.mxu1 %v2895_v0 }
 0x2f4   :  { %2469 = vmatpush3.msra.mxu1 %v3037_v42 }
 0x2f5   :  { %2470 = vmatprep.subr.mxu1 %v2895_v0 }
 0x2f6   :  { %2471 = vmatpush3.msra.mxu1 %v3042_v44 }
 0x2f7   :  { %2472 = vmatprep.subr.mxu1 %v2895_v0 }
 0x2f8   :  { %2473 = vmatpush3.msra.mxu1 %v3048_v45 }
 0x2f9   :  { %2474 = vmatprep.subr.mxu1 %v2895_v0 }
 0x2fa   :  { %2475 = vmatpush3.msra.mxu1 %v3054_v46 }
 0x2fb   :  { %2509 = vmatprep.subr.mxu1 %v2895_v0 }
 0x3a4   :  { %v441_v61 = vpop.f32.mrf.mxu0 }
 0x3a5   :  { %v442_v62 = vadd.f32 %v3110_v60, %v441_v61 }
 0x3a6   :  { %v2448_v63 = vpop.f32.mrf.mxu0 }
 0x3a7   :  { %2688 = vtanh.f32 %v442_v62  ;;  %v2239_v13 = vmul.f32 -1.442695, %v442_v62  ;;  %v191_v63 = vadd.f32 %v3012_v14, %v3097_v55 }
 0x3ab   :  { %v556_v2 = vpop.f32.mrf.mxu1 }
 0x3ac   :  { %v560_v5 = vadd.f32 %v556_v2, %v186_v1 }
 0x3ad   :  { %v2459_v6 = vpop.f32.mrf.mxu1 }
 0x3ae   :  { %2690 = vtanh.f32 %v560_v5  ;;  %v2241_v15 = vmul.f32 -1.442695, %v560_v5 }
 0x3af   :  { %2692 = vpow2.f32 %v2239_v13 }
 0x3b0   :  { %2694 = vpow2.f32 %v2241_v15 }
 0x3b4   :  { %v2689_v8 = vpop.eup %2688 }
 0x3b5   :  { %459 = vrot.lane.b32.xlu0 %v2689_v8, %s2897_s28 }
 0x3b9   :  { %454 = vrot.lane.b32.xlu0 %v445_v10, %s2898_s29 }
 0x3bb   :  { %v2691_v11 = vpop.eup %2690 }
 0x3bc   :  { %v2693_v16 = vpop.eup %2692 }
 0x3bd   :  { %575 = vrot.lane.b32.xlu0 %v2691_v11, %s2897_s28  ;;  %v449_v17 = vadd.f32 1.0, %v2693_v16  ;;  %v2695_v12 = vpop.eup %2694 }
 0x3be   :  { %v565_v18 = vadd.f32 1.0, %v2695_v12 }
 0x3bf   :  { %2696 = vrcp.f32 %v449_v17 }
 0x3c0   :  { %2698 = vrcp.f32 %v565_v18 }
 0x3cc   :  { %v2697_v19 = vpop.eup %2696 }
 0x3cd   :  { %v2699_v24 = vpop.eup %2698 }
 0x427   :  { %v460_v20 = vpop.permute.xlu0 %459 }
 0x428   :  { %v462_v21 = vmul.f32 %v2697_v19, %v460_v20 }
 0x42a   :  { %464 = vrot.lane.b32.xlu1 %v462_v21, %s2898_s29 }
 0x42b   :  { %v455_v22 = vpop.permute.xlu0 %454 }
 0x42c   :  { %v457_v27 = vmul.f32 %v2697_v19, %v455_v22 }
 0x42e   :  { %570 = vrot.lane.b32.xlu1 %v561_v23, %s2898_s29 }
 0x42f   :  { %v576_v25 = vpop.permute.xlu0 %575 }
 0x430   :  { %v578_v26 = vmul.f32 %v2699_v24, %v576_v25 }
 0x432   :  { %580 = vrot.lane.b32.xlu0 %v578_v26, %s2898_s29 }
 0x49c   :  { %v465_v28 = vpop.permute.xlu1 %464 }
 0x49d   :  { %v467_v29 = vadd.f32 %v465_v28, %v457_v27 }
 0x49f   :  { %2700 = vtanh.f32 %v467_v29 }
 0x4a0   :  { %v571_v30 = vpop.permute.xlu1 %570 }
 0x4a1   :  { %v573_v32 = vmul.f32 %v2699_v24, %v571_v30 }
 0x4a4   :  { %v581_v33 = vpop.permute.xlu0 %580 }
 0x4a5   :  { %v583_v35 = vadd.f32 %v581_v33, %v573_v32 }
 0x4a7   :  { %2702 = vtanh.f32 %v583_v35 }
 0x4ac   :  { %v2701_v37 = vpop.eup %2700 }
 0x4ad   :  { %470 = vrot.lane.b32.xlu1 %v2701_v37, %s2897_s28 }
 0x4b4   :  { %v2703_v38 = vpop.eup %2702 }
 0x4b5   :  { %586 = vrot.lane.b32.xlu1 %v2703_v38, %s2897_s28 }
 0x51f   :  { %v471_v40 = vpop.permute.xlu1 %470 }
 0x520   :  { %v473_v41 = vmul.f32 %v2697_v19, %v471_v40 }
 0x522   :  { %475 = vrot.lane.b32.xlu0 %v473_v41, %s2898_s29 }
 0x527   :  { %v587_v43 = vpop.permute.xlu1 %586 }
 0x528   :  { %v589_v47 = vmul.f32 %v2699_v24, %v587_v43 }
 0x52a   :  { %591 = vrot.lane.b32.xlu0 %v589_v47, %s2898_s29 }
 0x52e   :  { %480 = vrot.lane.b32.xlu0 %v467_v29, %s2899_s30 }
 0x532   :  { %596 = vrot.lane.b32.xlu0 %v583_v35, %s2899_s30 }
 0x594   :  { %v476_v48 = vpop.permute.xlu0 %475 }
 0x595   :  { %478 = vst.msk [vmem:[#allocation5] sm:$0xff] %vm89_vm0, %v476_v48 }
 0x59c   :  { %v592_v49 = vpop.permute.xlu0 %591  ;;  %v600_v50 = vld [vmem:[#allocation5] sm:$0xff] }
 0x59d   :  { %594 = vst.msk [vmem:[#allocation3] sm:$0xff] %vm89_vm0, %v592_v49  ;;  %602 = vrot.lane.b32.xlu1 %v600_v50, %s2898_s29 }
 0x5a0   :  { %v481_v51 = vpop.permute.xlu0 %480 }
 0x5a1   :  { %483 = vst.msk [vmem:[#allocation6] sm:$0xff] %vm89_vm0, %v481_v51 }
 0x5a4   :  { %v597_v52 = vpop.permute.xlu0 %596  ;;  %v720_v53 = vld [vmem:[#allocation3] sm:$0xff] }
 0x5a5   :  { %599 = vst.msk [vmem:[#allocation4] sm:$0xff] %vm89_vm0, %v597_v52  ;;  %2488 = vmatmul.mubr.msk.f32.vlgmr.msra.gmra.mxu0 %vm89_vm0, %v720_v53 }
 0x5a6   :  { %2491 = vmatpush3.msra.mxu0 %v3018_v31  ;;  %2506 = vmatprep.mubr.msk.f32.mxu0 %vm2896_vm1, %v2895_v0 }
 0x5a7   :  { %2492 = vmatprep.subr.mxu0 %v2895_v0 }
 0x5a8   :  { %2493 = vmatpush3.msra.mxu0 %v3022_v34  ;;  %v679_v13 = vld [vmem:[#allocation6] sm:$0xff] }
 0x5a9   :  { %2494 = vmatprep.subr.mxu0 %v2895_v0 }
 0x5aa   :  { %2495 = vmatpush3.msra.mxu0 %v3026_v36 }
 0x5ab   :  { %2496 = vmatprep.subr.mxu0 %v2895_v0 }
 0x5ac   :  { %2497 = vmatpush3.msra.mxu0 %v3031_v39  ;;  %v795_v24 = vld [vmem:[#allocation4] sm:$0xff] }
 0x5ad   :  { %2498 = vmatprep.subr.mxu0 %v2895_v0 }
 0x5ae   :  { %2499 = vmatpush3.msra.mxu0 %v3037_v42 }
 0x5af   :  { %2500 = vmatprep.subr.mxu0 %v2895_v0 }
 0x5b0   :  { %2501 = vmatpush3.msra.mxu0 %v3042_v44 }
 0x5b1   :  { %2502 = vmatprep.subr.mxu0 %v2895_v0 }
 0x5b2   :  { %2503 = vmatpush3.msra.mxu0 %v3048_v45 }
 0x5b3   :  { %2504 = vmatprep.subr.mxu0 %v2895_v0 }
 0x5b4   :  { %2505 = vmatpush3.msra.mxu0 %v3054_v46 }
 0x5b5   :  { %2539 = vmatprep.subr.mxu0 %v2895_v0 }
 0x60f   :  { %v603_v61 = vpop.permute.xlu1 %602 }
 0x610   :  { %v605_v62 = vsel %vm89_vm0, %v592_v49, %v603_v61 }
 0x611   :  { %2477 = vmatmul.mubr.msk.f32.vlgmr.msra.gmra.mxu1 %vm371_vm2, %v605_v62 }
 0x612   :  { %2510 = vmatpush3.msra.mxu1 %v2971_v3  ;;  %2517 = vmatprep.mubr.msk.f32.mxu1 %vm2896_vm1, %v2895_v0 }
 0x613   :  { %2511 = vmatprep.subr.mxu1 %v2895_v0 }
 0x614   :  { %2512 = vmatpush3.msra.mxu1 %v2974_v4 }
 0x615   :  { %2513 = vmatprep.subr.mxu1 %v2895_v0 }
 0x616   :  { %2514 = vmatpush3.msra.mxu1 %v2981_v7 }
 0x617   :  { %2515 = vmatprep.subr.mxu1 %v2895_v0 }
 0x618   :  { %2516 = vmatpush3.msra.mxu1 %v2988_v9 }
 0x619   :  { %2520 = vmatprep.subr.mxu1 %v2895_v0 }
 0x665   :  { %v790_v1 = vpop.f32.mrf.mxu0 }
 0x666   :  { %v794_v2 = vadd.f32 %v790_v1, %v191_v63  ;;  %v196_v1 = vadd.f32 %v3095_v54, %v3012_v14 }
 0x667   :  { %v2489_v5 = vpop.f32.mrf.mxu0 }
 0x668   :  { %v2245_v55 = vmul.f32 -1.442695, %v794_v2 }
 0x6d1   :  { %v675_v6 = vpop.f32.mrf.mxu1 }
 0x6d2   :  { %v676_v8 = vadd.f32 %v3110_v60, %v675_v6 }
 0x6d3   :  { %v2478_v10 = vpop.f32.mrf.mxu1 }
 0x6d4   :  { %2704 = vtanh.f32 %v676_v8  ;;  %v2243_v16 = vmul.f32 -1.442695, %v676_v8 }
 0x6d5   :  { %2706 = vtanh.f32 %v794_v2 }
 0x6d6   :  { %2708 = vpow2.f32 %v2243_v16 }
 0x6d7   :  { %2710 = vpow2.f32 %v2245_v55 }
 0x6e1   :  { %v2705_v11 = vpop.eup %2704 }
 0x6e2   :  { %693 = vrot.lane.b32.xlu1 %v2705_v11, %s2897_s28  ;;  %v2707_v15 = vpop.eup %2706 }
 0x6e3   :  { %v2709_v17 = vpop.eup %2708 }
 0x6e4   :  { %v683_v12 = vadd.f32 1.0, %v2709_v17  ;;  %v2711_v18 = vpop.eup %2710 }
 0x6e5   :  { %v799_v19 = vadd.f32 1.0, %v2711_v18 }
 0x6e6   :  { %688 = vrot.lane.b32.xlu1 %v679_v13, %s2898_s29  ;;  %2712 = vrcp.f32 %v683_v12 }
 0x6e7   :  { %2714 = vrcp.f32 %v799_v19 }
 0x6ea   :  { %809 = vrot.lane.b32.xlu1 %v2707_v15, %s2897_s28 }
 0x6f3   :  { %v2713_v20 = vpop.eup %2712 }
 0x6f4   :  { %v2715_v25 = vpop.eup %2714 }
 0x754   :  { %v694_v21 = vpop.permute.xlu1 %693 }
 0x755   :  { %v696_v22 = vmul.f32 %v2713_v20, %v694_v21 }
 0x757   :  { %698 = vrot.lane.b32.xlu0 %v696_v22, %s2898_s29 }
 0x758   :  { %v689_v23 = vpop.permute.xlu1 %688 }
 0x759   :  { %v691_v28 = vmul.f32 %v2713_v20, %v689_v23 }
 0x75b   :  { %804 = vrot.lane.b32.xlu0 %v795_v24, %s2898_s29 }
 0x75c   :  { %v810_v26 = vpop.permute.xlu1 %809 }
 0x75d   :  { %v812_v27 = vmul.f32 %v2715_v25, %v810_v26 }
 0x75f   :  { %814 = vrot.lane.b32.xlu1 %v812_v27, %s2898_s29 }
 0x7c9   :  { %v699_v29 = vpop.permute.xlu0 %698 }
 0x7ca   :  { %v701_v30 = vadd.f32 %v699_v29, %v691_v28 }
 0x7cc   :  { %2716 = vtanh.f32 %v701_v30 }
 0x7cd   :  { %v805_v32 = vpop.permute.xlu0 %804 }
 0x7ce   :  { %v807_v33 = vmul.f32 %v2715_v25, %v805_v32 }
 0x7d1   :  { %v815_v35 = vpop.permute.xlu1 %814 }
 0x7d2   :  { %v817_v37 = vadd.f32 %v815_v35, %v807_v33 }
 0x7d4   :  { %2718 = vtanh.f32 %v817_v37 }
 0x7d9   :  { %v2717_v38 = vpop.eup %2716 }
 0x7da   :  { %704 = vrot.lane.b32.xlu0 %v2717_v38, %s2897_s28 }
 0x7e1   :  { %v2719_v40 = vpop.eup %2718 }
 0x7e2   :  { %820 = vrot.lane.b32.xlu0 %v2719_v40, %s2897_s28 }
 0x84c   :  { %v705_v41 = vpop.permute.xlu0 %704 }
 0x84d   :  { %v707_v43 = vmul.f32 %v2713_v20, %v705_v41 }
 0x84f   :  { %709 = vrot.lane.b32.xlu1 %v707_v43, %s2898_s29 }
 0x854   :  { %v821_v47 = vpop.permute.xlu0 %820 }
 0x855   :  { %v823_v48 = vmul.f32 %v2715_v25, %v821_v47 }
 0x857   :  { %825 = vrot.lane.b32.xlu1 %v823_v48, %s2898_s29 }
 0x85b   :  { %714 = vrot.lane.b32.xlu1 %v701_v30, %s2899_s30 }
 0x85f   :  { %830 = vrot.lane.b32.xlu1 %v817_v37, %s2899_s30 }
 0x8c1   :  { %v710_v49 = vpop.permute.xlu1 %709 }
 0x8c2   :  { %712 = vst.msk [vmem:[#allocation5] sm:$0xff] %vm89_vm0, %v710_v49 }
 0x8c9   :  { %v826_v50 = vpop.permute.xlu1 %825  ;;  %v834_v51 = vld [vmem:[#allocation5] sm:$0xff] }
 0x8ca   :  { %828 = vst.msk [vmem:[#allocation3] sm:$0xff] %vm89_vm0, %v826_v50  ;;  %836 = vrot.lane.b32.xlu0 %v834_v51, %s2898_s29 }
 0x8cd   :  { %v715_v52 = vpop.permute.xlu1 %714 }
 0x8ce   :  { %717 = vst.msk [vmem:[#allocation6] sm:$0xff] %vm89_vm0, %v715_v52 }
 0x8d1   :  { %v831_v53 = vpop.permute.xlu1 %830  ;;  %v954_v61 = vld [vmem:[#allocation3] sm:$0xff] }
 0x8d2   :  { %833 = vst.msk [vmem:[#allocation4] sm:$0xff] %vm89_vm0, %v831_v53  ;;  %2518 = vmatmul.mubr.msk.f32.vlgmr.msra.gmra.mxu1 %vm89_vm0, %v954_v61 }
 0x8d3   :  { %2521 = vmatpush3.msra.mxu1 %v3018_v31  ;;  %2536 = vmatprep.mubr.msk.f32.mxu1 %vm2896_vm1, %v2895_v0 }
 0x8d4   :  { %2522 = vmatprep.subr.mxu1 %v2895_v0 }
 0x8d5   :  { %2523 = vmatpush3.msra.mxu1 %v3022_v34  ;;  %v913_v15 = vld [vmem:[#allocation6] sm:$0xff] }
 0x8d6   :  { %2524 = vmatprep.subr.mxu1 %v2895_v0 }
 0x8d7   :  { %2525 = vmatpush3.msra.mxu1 %v3026_v36 }
 0x8d8   :  { %2526 = vmatprep.subr.mxu1 %v2895_v0 }
 0x8d9   :  { %2527 = vmatpush3.msra.mxu1 %v3031_v39  ;;  %v1029_v24 = vld [vmem:[#allocation4] sm:$0xff] }
 0x8da   :  { %2528 = vmatprep.subr.mxu1 %v2895_v0 }
 0x8db   :  { %2529 = vmatpush3.msra.mxu1 %v3037_v42 }
 0x8dc   :  { %2530 = vmatprep.subr.mxu1 %v2895_v0 }
 0x8dd   :  { %2531 = vmatpush3.msra.mxu1 %v3042_v44 }
 0x8de   :  { %2532 = vmatprep.subr.mxu1 %v2895_v0 }
 0x8df   :  { %2533 = vmatpush3.msra.mxu1 %v3048_v45 }
 0x8e0   :  { %2534 = vmatprep.subr.mxu1 %v2895_v0 }
 0x8e1   :  { %2535 = vmatpush3.msra.mxu1 %v3054_v46 }
 0x8e2   :  { %2569 = vmatprep.subr.mxu1 %v2895_v0 }
 0x93c   :  { %v837_v62 = vpop.permute.xlu0 %836 }
 0x93d   :  { %v839_v63 = vsel %vm89_vm0, %v826_v50, %v837_v62 }
 0x93e   :  { %2507 = vmatmul.mubr.msk.f32.vlgmr.msra.gmra.mxu0 %vm371_vm2, %v839_v63 }
 0x93f   :  { %2540 = vmatpush3.msra.mxu0 %v2971_v3  ;;  %2547 = vmatprep.mubr.msk.f32.mxu0 %vm2896_vm1, %v2895_v0 }
 0x940   :  { %2541 = vmatprep.subr.mxu0 %v2895_v0 }
 0x941   :  { %2542 = vmatpush3.msra.mxu0 %v2974_v4 }
 0x942   :  { %2543 = vmatprep.subr.mxu0 %v2895_v0 }
 0x943   :  { %2544 = vmatpush3.msra.mxu0 %v2981_v7 }
 0x944   :  { %2545 = vmatprep.subr.mxu0 %v2895_v0 }
 0x945   :  { %2546 = vmatpush3.msra.mxu0 %v2988_v9 }
 0x946   :  { %2550 = vmatprep.subr.mxu0 %v2895_v0 }
 0x992   :  { %v1024_v2 = vpop.f32.mrf.mxu1 }
 0x993   :  { %v1028_v5 = vadd.f32 %v1024_v2, %v196_v1 }
 0x994   :  { %v2519_v6 = vpop.f32.mrf.mxu1 }
 0x995   :  { %v2249_v54 = vmul.f32 -1.442695, %v1028_v5 }
 0x9fe   :  { %v909_v8 = vpop.f32.mrf.mxu0 }
 0x9ff   :  { %v910_v10 = vadd.f32 %v3110_v60, %v909_v8 }
 0xa00   :  { %v2508_v11 = vpop.f32.mrf.mxu0 }
 0xa01   :  { %2720 = vtanh.f32 %v910_v10  ;;  %v2247_v55 = vmul.f32 -1.442695, %v910_v10 }
 0xa02   :  { %2722 = vtanh.f32 %v1028_v5 }
 0xa03   :  { %2724 = vpow2.f32 %v2247_v55 }
 0xa04   :  { %2726 = vpow2.f32 %v2249_v54 }
 0xa0e   :  { %v2721_v13 = vpop.eup %2720 }
 0xa0f   :  { %927 = vrot.lane.b32.xlu0 %v2721_v13, %s2897_s28  ;;  %v2723_v16 = vpop.eup %2722 }
 0xa10   :  { %v2725_v17 = vpop.eup %2724 }
 0xa11   :  { %v917_v12 = vadd.f32 1.0, %v2725_v17  ;;  %v2727_v18 = vpop.eup %2726 }
 0xa12   :  { %v1033_v19 = vadd.f32 1.0, %v2727_v18 }
 0xa13   :  { %922 = vrot.lane.b32.xlu0 %v913_v15, %s2898_s29  ;;  %2728 = vrcp.f32 %v917_v12 }
 0xa14   :  { %2730 = vrcp.f32 %v1033_v19 }
 0xa17   :  { %1043 = vrot.lane.b32.xlu0 %v2723_v16, %s2897_s28 }
 0xa20   :  { %v2729_v20 = vpop.eup %2728 }
 0xa21   :  { %v2731_v25 = vpop.eup %2730 }
 0xa81   :  { %v928_v21 = vpop.permute.xlu0 %927 }
 0xa82   :  { %v930_v22 = vmul.f32 %v2729_v20, %v928_v21 }
 0xa84   :  { %932 = vrot.lane.b32.xlu1 %v930_v22, %s2898_s29 }
 0xa85   :  { %v923_v23 = vpop.permute.xlu0 %922 }
 0xa86   :  { %v925_v28 = vmul.f32 %v2729_v20, %v923_v23 }
 0xa88   :  { %1038 = vrot.lane.b32.xlu1 %v1029_v24, %s2898_s29 }
 0xa89   :  { %v1044_v26 = vpop.permute.xlu0 %1043 }
 0xa8a   :  { %v1046_v27 = vmul.f32 %v2731_v25, %v1044_v26 }
 0xa8c   :  { %1048 = vrot.lane.b32.xlu0 %v1046_v27, %s2898_s29 }
 0xaf6   :  { %v933_v29 = vpop.permute.xlu1 %932 }
 0xaf7   :  { %v935_v30 = vadd.f32 %v933_v29, %v925_v28 }
 0xaf9   :  { %2732 = vtanh.f32 %v935_v30 }
 0xafa   :  { %v1039_v32 = vpop.permute.xlu1 %1038 }
 0xafb   :  { %v1041_v33 = vmul.f32 %v2731_v25, %v1039_v32 }
 0xafe   :  { %v1049_v35 = vpop.permute.xlu0 %1048 }
 0xaff   :  { %v1051_v37 = vadd.f32 %v1049_v35, %v1041_v33 }
 0xb01   :  { %2734 = vtanh.f32 %v1051_v37 }
 0xb06   :  { %v2733_v38 = vpop.eup %2732 }
 0xb07   :  { %938 = vrot.lane.b32.xlu1 %v2733_v38, %s2897_s28 }
 0xb0e   :  { %v2735_v40 = vpop.eup %2734 }
 0xb0f   :  { %1054 = vrot.lane.b32.xlu1 %v2735_v40, %s2897_s28 }
 0xb79   :  { %v939_v41 = vpop.permute.xlu1 %938 }
 0xb7a   :  { %v941_v43 = vmul.f32 %v2729_v20, %v939_v41 }
 0xb7c   :  { %943 = vrot.lane.b32.xlu0 %v941_v43, %s2898_s29 }
 0xb81   :  { %v1055_v47 = vpop.permute.xlu1 %1054 }
 0xb82   :  { %v1057_v48 = vmul.f32 %v2731_v25, %v1055_v47 }
 0xb84   :  { %1059 = vrot.lane.b32.xlu0 %v1057_v48, %s2898_s29 }
 0xb88   :  { %948 = vrot.lane.b32.xlu0 %v935_v30, %s2899_s30 }
 0xb8c   :  { %1064 = vrot.lane.b32.xlu0 %v1051_v37, %s2899_s30 }
 0xbee   :  { %v944_v49 = vpop.permute.xlu0 %943 }
 0xbef   :  { %946 = vst.msk [vmem:[#allocation5] sm:$0xff] %vm89_vm0, %v944_v49 }
 0xbf6   :  { %v1060_v50 = vpop.permute.xlu0 %1059  ;;  %v1068_v51 = vld [vmem:[#allocation5] sm:$0xff] }
 0xbf7   :  { %1062 = vst.msk [vmem:[#allocation3] sm:$0xff] %vm89_vm0, %v1060_v50  ;;  %1070 = vrot.lane.b32.xlu1 %v1068_v51, %s2898_s29 }
 0xbfa   :  { %v949_v52 = vpop.permute.xlu0 %948 }
 0xbfb   :  { %951 = vst.msk [vmem:[#allocation6] sm:$0xff] %vm89_vm0, %v949_v52 }
 0xbfe   :  { %v1065_v53 = vpop.permute.xlu0 %1064  ;;  %v1188_v61 = vld [vmem:[#allocation3] sm:$0xff] }
 0xbff   :  { %1067 = vst.msk [vmem:[#allocation4] sm:$0xff] %vm89_vm0, %v1065_v53  ;;  %2548 = vmatmul.mubr.msk.f32.vlgmr.msra.gmra.mxu0 %vm89_vm0, %v1188_v61 }
 0xc00   :  { %2551 = vmatpush3.msra.mxu0 %v3018_v31  ;;  %2566 = vmatprep.mubr.msk.f32.mxu0 %vm2896_vm1, %v2895_v0 }
 0xc01   :  { %2552 = vmatprep.subr.mxu0 %v2895_v0 }
 0xc02   :  { %2553 = vmatpush3.msra.mxu0 %v3022_v34 }
 0xc03   :  { %2554 = vmatprep.subr.mxu0 %v2895_v0 }
 0xc04   :  { %2555 = vmatpush3.msra.mxu0 %v3026_v36 }
 0xc05   :  { %2556 = vmatprep.subr.mxu0 %v2895_v0 }
 0xc06   :  { %2557 = vmatpush3.msra.mxu0 %v3031_v39  ;;  %v1263_v19 = vld [vmem:[#allocation4] sm:$0xff] }
 0xc07   :  { %2558 = vmatprep.subr.mxu0 %v2895_v0 }
 0xc08   :  { %2559 = vmatpush3.msra.mxu0 %v3037_v42 }
 0xc09   :  { %2560 = vmatprep.subr.mxu0 %v2895_v0 }
 0xc0a   :  { %2561 = vmatpush3.msra.mxu0 %v3042_v44 }
 0xc0b   :  { %2562 = vmatprep.subr.mxu0 %v2895_v0 }
 0xc0c   :  { %2563 = vmatpush3.msra.mxu0 %v3048_v45 }
 0xc0d   :  { %2564 = vmatprep.subr.mxu0 %v2895_v0 }
 0xc0e   :  { %2565 = vmatpush3.msra.mxu0 %v3054_v46 }
 0xc0f   :  { %2599 = vmatprep.subr.mxu0 %v2895_v0 }
 0xc69   :  { %v1071_v62 = vpop.permute.xlu1 %1070 }
 0xc6a   :  { %v1073_v63 = vsel %vm89_vm0, %v1060_v50, %v1071_v62 }
 0xc6b   :  { %2537 = vmatmul.mubr.msk.f32.vlgmr.msra.gmra.mxu1 %vm371_vm2, %v1073_v63 }
 0xc6c   :  { %2570 = vmatpush3.msra.mxu1 %v2971_v3  ;;  %2577 = vmatprep.mubr.msk.f32.mxu1 %vm2896_vm1, %v2895_v0  ;;  %v201_v3 = vadd.f32 %v3012_v14, %v3101_v57 }
 0xc6d   :  { %2571 = vmatprep.subr.mxu1 %v2895_v0 }
 0xc6e   :  { %2572 = vmatpush3.msra.mxu1 %v2974_v4 }
 0xc6f   :  { %2573 = vmatprep.subr.mxu1 %v2895_v0 }
 0xc70   :  { %2574 = vmatpush3.msra.mxu1 %v2981_v7  ;;  %v1147_v7 = vld [vmem:[#allocation6] sm:$0xff] }
 0xc71   :  { %2575 = vmatprep.subr.mxu1 %v2895_v0 }
 0xc72   :  { %2576 = vmatpush3.msra.mxu1 %v2988_v9 }
 0xc73   :  { %2580 = vmatprep.subr.mxu1 %v2895_v0 }
 0xcbf   :  { %v1258_v1 = vpop.f32.mrf.mxu0 }
 0xcc0   :  { %v1262_v2 = vadd.f32 %v1258_v1, %v201_v3 }
 0xcc1   :  { %v2549_v5 = vpop.f32.mrf.mxu0 }
 0xcc2   :  { %v2253_v57 = vmul.f32 -1.442695, %v1262_v2 }
 0xd2b   :  { %v1143_v6 = vpop.f32.mrf.mxu1 }
 0xd2c   :  { %v1144_v8 = vadd.f32 %v3110_v60, %v1143_v6 }
 0xd2d   :  { %v2538_v4 = vpop.f32.mrf.mxu1 }
 0xd2e   :  { %2736 = vtanh.f32 %v1144_v8  ;;  %v2251_v11 = vmul.f32 -1.442695, %v1144_v8 }
 0xd2f   :  { %2738 = vtanh.f32 %v1262_v2 }
 0xd30   :  { %2740 = vpow2.f32 %v2251_v11 }
 0xd31   :  { %2742 = vpow2.f32 %v2253_v57 }
 0xd3b   :  { %v2737_v10 = vpop.eup %2736 }
 0xd3c   :  { %1161 = vrot.lane.b32.xlu1 %v2737_v10, %s2897_s28  ;;  %v2739_v9 = vpop.eup %2738 }
 0xd3d   :  { %v2741_v13 = vpop.eup %2740 }
 0xd3e   :  { %v1151_v15 = vadd.f32 1.0, %v2741_v13  ;;  %v2743_v16 = vpop.eup %2742 }
 0xd3f   :  { %v1267_v55 = vadd.f32 1.0, %v2743_v16 }
 0xd40   :  { %1156 = vrot.lane.b32.xlu1 %v1147_v7, %s2898_s29  ;;  %2744 = vrcp.f32 %v1151_v15 }
 0xd41   :  { %2746 = vrcp.f32 %v1267_v55 }
 0xd44   :  { %1277 = vrot.lane.b32.xlu1 %v2739_v9, %s2897_s28 }
 0xd4d   :  { %v2745_v54 = vpop.eup %2744 }
 0xd4e   :  { %v2747_v20 = vpop.eup %2746 }
 0xdae   :  { %v1162_v17 = vpop.permute.xlu1 %1161 }
 0xdaf   :  { %v1164_v12 = vmul.f32 %v2745_v54, %v1162_v17 }
 0xdb1   :  { %1166 = vrot.lane.b32.xlu0 %v1164_v12, %s2898_s29 }
 0xdb2   :  { %v1157_v18 = vpop.permute.xlu1 %1156 }
 0xdb3   :  { %v1159_v23 = vmul.f32 %v2745_v54, %v1157_v18 }
 0xdb5   :  { %1272 = vrot.lane.b32.xlu0 %v1263_v19, %s2898_s29 }
 0xdb6   :  { %v1278_v21 = vpop.permute.xlu1 %1277 }
 0xdb7   :  { %v1280_v22 = vmul.f32 %v2747_v20, %v1278_v21 }
 0xdb9   :  { %1282 = vrot.lane.b32.xlu1 %v1280_v22, %s2898_s29 }
 0xe23   :  { %v1167_v24 = vpop.permute.xlu0 %1166 }
 0xe24   :  { %v1169_v25 = vadd.f32 %v1167_v24, %v1159_v23 }
 0xe26   :  { %2748 = vtanh.f32 %v1169_v25 }
 0xe27   :  { %v1273_v26 = vpop.permute.xlu0 %1272 }
 0xe28   :  { %v1275_v27 = vmul.f32 %v2747_v20, %v1273_v26 }
 0xe2b   :  { %v1283_v28 = vpop.permute.xlu1 %1282 }
 0xe2c   :  { %v1285_v29 = vadd.f32 %v1283_v28, %v1275_v27 }
 0xe2e   :  { %2750 = vtanh.f32 %v1285_v29 }
 0xe33   :  { %v2749_v30 = vpop.eup %2748 }
 0xe34   :  { %1172 = vrot.lane.b32.xlu0 %v2749_v30, %s2897_s28 }
 0xe3b   :  { %v2751_v32 = vpop.eup %2750 }
 0xe3c   :  { %1288 = vrot.lane.b32.xlu0 %v2751_v32, %s2897_s28  ;;  %v3345_v32 = vld [vmem:[#allocation11 + $0x38] sm:$0xff] }
 0xea6   :  { %v1173_v33 = vpop.permute.xlu0 %1172 }
 0xea7   :  { %v1175_v35 = vmul.f32 %v2745_v54, %v1173_v33  ;;  %v3351_v33 = vld [vmem:[#allocation11 + $0x30] sm:$0xff] }
 0xea9   :  { %1177 = vrot.lane.b32.xlu1 %v1175_v35, %s2898_s29  ;;  %v3355_v35 = vld [vmem:[#allocation11 + $0x28] sm:$0xff] }
 0xeae   :  { %v1289_v37 = vpop.permute.xlu0 %1288 }
 0xeaf   :  { %v1291_v38 = vmul.f32 %v2747_v20, %v1289_v37  ;;  %v3359_v37 = vld [vmem:[#allocation11 + $0x20] sm:$0xff] }
 0xeb1   :  { %1293 = vrot.lane.b32.xlu1 %v1291_v38, %s2898_s29  ;;  %v3363_v38 = vld [vmem:[#allocation11 + $0x18] sm:$0xff] }
 0xeb5   :  { %1182 = vrot.lane.b32.xlu1 %v1169_v25, %s2899_s30 }
 0xeb9   :  { %1298 = vrot.lane.b32.xlu1 %v1285_v29, %s2899_s30 }
 0xf1b   :  { %v1178_v40 = vpop.permute.xlu1 %1177 }
 0xf1c   :  { %1180 = vst.msk [vmem:[#allocation5] sm:$0xff] %vm89_vm0, %v1178_v40  ;;  %v3367_v40 = vld [vmem:[#allocation11 + $0x10] sm:$0xff] }
 0xf23   :  { %v1294_v41 = vpop.permute.xlu1 %1293  ;;  %v1302_v43 = vld [vmem:[#allocation5] sm:$0xff] }
 0xf24   :  { %1296 = vst.msk [vmem:[#allocation3] sm:$0xff] %vm89_vm0, %v1294_v41  ;;  %1304 = vrot.lane.b32.xlu0 %v1302_v43, %s2898_s29  ;;  %v3375_v43 = vld [vmem:[#allocation11] sm:$0xff] }
 0xf27   :  { %v1183_v47 = vpop.permute.xlu1 %1182 }
 0xf28   :  { %1185 = vst.msk [vmem:[#allocation6] sm:$0xff] %vm89_vm0, %v1183_v47 }
 0xf2b   :  { %v1299_v48 = vpop.permute.xlu1 %1298  ;;  %v1422_v49 = vld [vmem:[#allocation3] sm:$0xff] }
 0xf2c   :  { %1301 = vst.msk [vmem:[#allocation4] sm:$0xff] %vm89_vm0, %v1299_v48  ;;  %2578 = vmatmul.mubr.msk.f32.vlgmr.msra.gmra.mxu1 %vm89_vm0, %v1422_v49 }
 0xf2d   :  { %2581 = vmatpush3.msra.mxu1 %v3018_v31  ;;  %2596 = vmatprep.mubr.msk.f32.mxu1 %vm2896_vm1, %v2895_v0 }
 0xf2e   :  { %2582 = vmatprep.subr.mxu1 %v2895_v0 }
 0xf2f   :  { %2583 = vmatpush3.msra.mxu1 %v3022_v34  ;;  %v1381_v63 = vld [vmem:[#allocation6] sm:$0xff] }
 0xf30   :  { %2584 = vmatprep.subr.mxu1 %v2895_v0 }
 0xf31   :  { %2585 = vmatpush3.msra.mxu1 %v3026_v36  ;;  %v3306_v36 = vld [vmem:[#allocation9 + $0x18] sm:$0xff] }
 0xf32   :  { %2586 = vmatprep.subr.mxu1 %v2895_v0 }
 0xf33   :  { %2587 = vmatpush3.msra.mxu1 %v3031_v39  ;;  %v3312_v39 = vld [vmem:[#allocation9 + $0x10] sm:$0xff]  ;;  %v1497_v9 = vld [vmem:[#allocation4] sm:$0xff] }
 0xf34   :  { %2588 = vmatprep.subr.mxu1 %v2895_v0 }
 0xf35   :  { %2589 = vmatpush3.msra.mxu1 %v3037_v42  ;;  %v3316_v42 = vld [vmem:[#allocation9 + $0x8] sm:$0xff] }
 0xf36   :  { %2590 = vmatprep.subr.mxu1 %v2895_v0 }
 0xf37   :  { %2591 = vmatpush3.msra.mxu1 %v3042_v44  ;;  %v3320_v44 = vld [vmem:[#allocation9] sm:$0xff] }
 0xf38   :  { %2592 = vmatprep.subr.mxu1 %v2895_v0 }
 0xf39   :  { %2593 = vmatpush3.msra.mxu1 %v3048_v45  ;;  %v206_v45 = vadd.f32 %v3099_v56, %v3012_v14 }
 0xf3a   :  { %2594 = vmatprep.subr.mxu1 %v2895_v0 }
 0xf3b   :  { %2595 = vmatpush3.msra.mxu1 %v3054_v46 }
 0xf3c   :  { %2629 = vmatprep.subr.mxu1 %v2895_v0 }
 0xf96   :  { %v1305_v31 = vpop.permute.xlu0 %1304 }
 0xf97   :  { %v1307_v34 = vsel %vm89_vm0, %v1294_v41, %v1305_v31  ;;  %v3371_v41 = vld [vmem:[#allocation11 + $0x8] sm:$0xff] }
 0xf98   :  { %2567 = vmatmul.mubr.msk.f32.vlgmr.msra.gmra.mxu0 %vm371_vm2, %v1307_v34 }
 0xf99   :  { %2600 = vmatpush3.msra.mxu0 %v3306_v36  ;;  %2607 = vmatprep.mubr.msk.f32.mxu0 %vm2896_vm1, %v2895_v0 }
 0xf9a   :  { %2601 = vmatprep.subr.mxu0 %v2895_v0 }
 0xf9b   :  { %2602 = vmatpush3.msra.mxu0 %v3312_v39 }
 0xf9c   :  { %2603 = vmatprep.subr.mxu0 %v2895_v0 }
 0xf9d   :  { %2604 = vmatpush3.msra.mxu0 %v3316_v42 }
 0xf9e   :  { %2605 = vmatprep.subr.mxu0 %v2895_v0 }
 0xf9f   :  { %2606 = vmatpush3.msra.mxu0 %v3320_v44 }
 0xfa0   :  { %2610 = vmatprep.subr.mxu0 %v2895_v0 }
 0xfec   :  { %v1492_v46 = vpop.f32.mrf.mxu1 }
 0xfed   :  { %v1496_v50 = vadd.f32 %v1492_v46, %v206_v45 }
 0xfee   :  { %v2579_v51 = vpop.f32.mrf.mxu1 }
 0xfef   :  { %v2257_v14 = vmul.f32 -1.442695, %v1496_v50 }
0x1058   :  { %v1377_v52 = vpop.f32.mrf.mxu0 }
0x1059   :  { %v1378_v53 = vadd.f32 %v3110_v60, %v1377_v52 }
0x105a   :  { %v2568_v61 = vpop.f32.mrf.mxu0 }
0x105b   :  { %2752 = vtanh.f32 %v1378_v53  ;;  %v2255_v1 = vmul.f32 -1.442695, %v1378_v53 }
0x105c   :  { %2754 = vtanh.f32 %v1496_v50 }
0x105d   :  { %2756 = vpow2.f32 %v2255_v1 }
0x105e   :  { %2758 = vpow2.f32 %v2257_v14 }
0x1068   :  { %v2753_v62 = vpop.eup %2752 }
0x1069   :  { %1395 = vrot.lane.b32.xlu0 %v2753_v62, %s2897_s28  ;;  %v2755_v3 = vpop.eup %2754 }
0x106a   :  { %v2757_v56 = vpop.eup %2756 }
0x106b   :  { %v1385_v2 = vadd.f32 1.0, %v2757_v56  ;;  %v2759_v5 = vpop.eup %2758 }
0x106c   :  { %v1501_v6 = vadd.f32 1.0, %v2759_v5 }
0x106d   :  { %1390 = vrot.lane.b32.xlu0 %v1381_v63, %s2898_s29  ;;  %2760 = vrcp.f32 %v1385_v2 }
0x106e   :  { %2762 = vrcp.f32 %v1501_v6 }
0x1071   :  { %1511 = vrot.lane.b32.xlu0 %v2755_v3, %s2897_s28 }
0x107a   :  { %v2761_v8 = vpop.eup %2760 }
0x107b   :  { %v2763_v11 = vpop.eup %2762 }
0x10db   :  { %v1396_v4 = vpop.permute.xlu0 %1395 }
0x10dc   :  { %v1398_v10 = vmul.f32 %v2761_v8, %v1396_v4 }
0x10de   :  { %1400 = vrot.lane.b32.xlu1 %v1398_v10, %s2898_s29 }
0x10df   :  { %v1391_v7 = vpop.permute.xlu0 %1390 }
0x10e0   :  { %v1393_v15 = vmul.f32 %v2761_v8, %v1391_v7 }
0x10e2   :  { %1506 = vrot.lane.b32.xlu1 %v1497_v9, %s2898_s29 }
0x10e3   :  { %v1512_v57 = vpop.permute.xlu0 %1511 }
0x10e4   :  { %v1514_v13 = vmul.f32 %v2763_v11, %v1512_v57 }
0x10e6   :  { %1516 = vrot.lane.b32.xlu0 %v1514_v13, %s2898_s29 }
0x1150   :  { %v1401_v16 = vpop.permute.xlu1 %1400 }
0x1151   :  { %v1403_v55 = vadd.f32 %v1401_v16, %v1393_v15 }
0x1153   :  { %2764 = vtanh.f32 %v1403_v55 }
0x1154   :  { %v1507_v54 = vpop.permute.xlu1 %1506 }
0x1155   :  { %v1509_v17 = vmul.f32 %v2763_v11, %v1507_v54 }
0x1158   :  { %v1517_v12 = vpop.permute.xlu0 %1516 }
0x1159   :  { %v1519_v18 = vadd.f32 %v1517_v12, %v1509_v17 }
0x115b   :  { %2766 = vtanh.f32 %v1519_v18 }
0x1160   :  { %v2765_v19 = vpop.eup %2764 }
0x1161   :  { %1406 = vrot.lane.b32.xlu1 %v2765_v19, %s2897_s28 }
0x1168   :  { %v2767_v20 = vpop.eup %2766 }
0x1169   :  { %1522 = vrot.lane.b32.xlu1 %v2767_v20, %s2897_s28 }
0x11d3   :  { %v1407_v21 = vpop.permute.xlu1 %1406 }
0x11d4   :  { %v1409_v22 = vmul.f32 %v2761_v8, %v1407_v21 }
0x11d6   :  { %1411 = vrot.lane.b32.xlu0 %v1409_v22, %s2898_s29 }
0x11db   :  { %v1523_v23 = vpop.permute.xlu1 %1522 }
0x11dc   :  { %v1525_v24 = vmul.f32 %v2763_v11, %v1523_v23 }
0x11de   :  { %1527 = vrot.lane.b32.xlu0 %v1525_v24, %s2898_s29 }
0x11e2   :  { %1416 = vrot.lane.b32.xlu0 %v1403_v55, %s2899_s30 }
0x11e6   :  { %1532 = vrot.lane.b32.xlu0 %v1519_v18, %s2899_s30 }
0x1248   :  { %v1412_v25 = vpop.permute.xlu0 %1411 }
0x1249   :  { %1414 = vst.msk [vmem:[#allocation5] sm:$0xff] %vm89_vm0, %v1412_v25 }
0x1250   :  { %v1528_v26 = vpop.permute.xlu0 %1527  ;;  %v1536_v27 = vld [vmem:[#allocation5] sm:$0xff] }
0x1251   :  { %1530 = vst.msk [vmem:[#allocation3] sm:$0xff] %vm89_vm0, %v1528_v26  ;;  %1538 = vrot.lane.b32.xlu1 %v1536_v27, %s2898_s29 }
0x1254   :  { %v1417_v28 = vpop.permute.xlu0 %1416 }
0x1255   :  { %1419 = vst.msk [vmem:[#allocation6] sm:$0xff] %vm89_vm0, %v1417_v28 }
0x1258   :  { %v1533_v29 = vpop.permute.xlu0 %1532  ;;  %v1656_v30 = vld [vmem:[#allocation3] sm:$0xff] }
0x1259   :  { %1535 = vst.msk [vmem:[#allocation4] sm:$0xff] %vm89_vm0, %v1533_v29  ;;  %2608 = vmatmul.mubr.msk.f32.vlgmr.msra.gmra.mxu0 %vm89_vm0, %v1656_v30  ;;  %v3443_v30 = vld [vmem:[%s3508_s5] ss:$0 sm:$0xff] }
0x125a   :  { %2611 = vmatpush3.msra.mxu0 %v3345_v32  ;;  %2626 = vmatprep.mubr.msk.f32.mxu0 %vm2896_vm1, %v2895_v0 }
0x125b   :  { %2612 = vmatprep.subr.mxu0 %v2895_v0 }
0x125c   :  { %2613 = vmatpush3.msra.mxu0 %v3351_v33  ;;  %v1615_v50 = vld [vmem:[#allocation6] sm:$0xff] }
0x125d   :  { %2614 = vmatprep.subr.mxu0 %v2895_v0 }
0x125e   :  { %2615 = vmatpush3.msra.mxu0 %v3355_v35 }
0x125f   :  { %2616 = vmatprep.subr.mxu0 %v2895_v0 }
0x1260   :  { %2617 = vmatpush3.msra.mxu0 %v3359_v37  ;;  %v1731_v56 = vld [vmem:[#allocation4] sm:$0xff] }
0x1261   :  { %2618 = vmatprep.subr.mxu0 %v2895_v0 }
0x1262   :  { %2619 = vmatpush3.msra.mxu0 %v3363_v38 }
0x1263   :  { %2620 = vmatprep.subr.mxu0 %v2895_v0 }
0x1264   :  { %2621 = vmatpush3.msra.mxu0 %v3367_v40 }
0x1265   :  { %2622 = vmatprep.subr.mxu0 %v2895_v0 }
0x1266   :  { %2623 = vmatpush3.msra.mxu0 %v3371_v41 }
0x1267   :  { %2624 = vmatprep.subr.mxu0 %v2895_v0 }
0x1268   :  { %2625 = vmatpush3.msra.mxu0 %v3375_v43 }
0x1269   :  { %2659 = vmatprep.subr.mxu0 %v2895_v0 }
0x12c3   :  { %v1539_v47 = vpop.permute.xlu1 %1538 }
0x12c4   :  { %v1541_v48 = vsel %vm89_vm0, %v1528_v26, %v1539_v47 }
0x12c5   :  { %2597 = vmatmul.mubr.msk.f32.vlgmr.msra.gmra.mxu1 %vm371_vm2, %v1541_v48 }
0x12c6   :  { %2630 = vmatpush3.msra.mxu1 %v3306_v36  ;;  %2637 = vmatprep.mubr.msk.f32.mxu1 %vm2896_vm1, %v2895_v0 }
0x12c7   :  { %2631 = vmatprep.subr.mxu1 %v2895_v0 }
0x12c8   :  { %2632 = vmatpush3.msra.mxu1 %v3312_v39  ;;  %v3395_v39 = vld [vmem:[%s3506_s3] ss:$0 sm:$0xff] }
0x12c9   :  { %2633 = vmatprep.subr.mxu1 %v2895_v0  ;;  %v216_v25 = vadd.f32 %v3395_v39, %v3103_v58 }
0x12ca   :  { %2634 = vmatpush3.msra.mxu1 %v3316_v42  ;;  %v211_v42 = vadd.f32 %v3395_v39, %v3105_v59 }
0x12cb   :  { %2635 = vmatprep.subr.mxu1 %v2895_v0 }
0x12cc   :  { %2636 = vmatpush3.msra.mxu1 %v3320_v44 }
0x12cd   :  { %2640 = vmatprep.subr.mxu1 %v2895_v0 }
0x1319   :  { %v1726_v49 = vpop.f32.mrf.mxu0 }
0x131a   :  { %v1730_v46 = vadd.f32 %v1726_v49, %v211_v42 }
0x131b   :  { %v2609_v31 = vpop.f32.mrf.mxu0 }
0x131c   :  { %v2261_v52 = vmul.f32 -1.442695, %v1730_v46 }
0x1385   :  { %v1611_v34 = vpop.f32.mrf.mxu1 }
0x1386   :  { %v1612_v36 = vadd.f32 %v3110_v60, %v1611_v34 }
0x1387   :  { %v2598_v45 = vpop.f32.mrf.mxu1 }
0x1388   :  { %2768 = vtanh.f32 %v1612_v36  ;;  %v2259_v60 = vmul.f32 -1.442695, %v1612_v36 }
0x1389   :  { %2770 = vtanh.f32 %v1730_v46 }
0x138a   :  { %2772 = vpow2.f32 %v2259_v60 }
0x138b   :  { %2774 = vpow2.f32 %v2261_v52 }
0x1395   :  { %v2769_v44 = vpop.eup %2768 }
0x1396   :  { %1629 = vrot.lane.b32.xlu1 %v2769_v44, %s2897_s28  ;;  %v2771_v51 = vpop.eup %2770 }
0x1397   :  { %v2773_v53 = vpop.eup %2772 }
0x1398   :  { %v1619_v61 = vadd.f32 1.0, %v2773_v53  ;;  %v2775_v62 = vpop.eup %2774 }
0x1399   :  { %v1735_v59 = vadd.f32 1.0, %v2775_v62 }
0x139a   :  { %1624 = vrot.lane.b32.xlu1 %v1615_v50, %s2898_s29  ;;  %2776 = vrcp.f32 %v1619_v61 }
0x139b   :  { %2778 = vrcp.f32 %v1735_v59 }
0x139e   :  { %1745 = vrot.lane.b32.xlu1 %v2771_v51, %s2897_s28 }
0x13a7   :  { %v2777_v63 = vpop.eup %2776 }
0x13a8   :  { %v2779_v2 = vpop.eup %2778 }
0x1408   :  { %v1630_v3 = vpop.permute.xlu1 %1629 }
0x1409   :  { %v1632_v1 = vmul.f32 %v2777_v63, %v1630_v3 }
0x140b   :  { %1634 = vrot.lane.b32.xlu0 %v1632_v1, %s2898_s29 }
0x140c   :  { %v1625_v14 = vpop.permute.xlu1 %1624 }
0x140d   :  { %v1627_v8 = vmul.f32 %v2777_v63, %v1625_v14 }
0x140f   :  { %1740 = vrot.lane.b32.xlu0 %v1731_v56, %s2898_s29 }
0x1410   :  { %v1746_v5 = vpop.permute.xlu1 %1745 }
0x1411   :  { %v1748_v6 = vmul.f32 %v2779_v2, %v1746_v5 }
0x1413   :  { %1750 = vrot.lane.b32.xlu1 %v1748_v6, %s2898_s29 }
0x147d   :  { %v1635_v4 = vpop.permute.xlu0 %1634 }
0x147e   :  { %v1637_v10 = vadd.f32 %v1635_v4, %v1627_v8 }
0x1480   :  { %2780 = vtanh.f32 %v1637_v10 }
0x1481   :  { %v1741_v7 = vpop.permute.xlu0 %1740 }
0x1482   :  { %v1743_v9 = vmul.f32 %v2779_v2, %v1741_v7 }
0x1485   :  { %v1751_v11 = vpop.permute.xlu1 %1750 }
0x1486   :  { %v1753_v57 = vadd.f32 %v1751_v11, %v1743_v9 }
0x1488   :  { %2782 = vtanh.f32 %v1753_v57 }
0x148d   :  { %v2781_v13 = vpop.eup %2780 }
0x148e   :  { %1640 = vrot.lane.b32.xlu0 %v2781_v13, %s2897_s28 }
0x1495   :  { %v2783_v15 = vpop.eup %2782 }
0x1496   :  { %1756 = vrot.lane.b32.xlu0 %v2783_v15, %s2897_s28 }
0x1500   :  { %v1641_v16 = vpop.permute.xlu0 %1640 }
0x1501   :  { %v1643_v55 = vmul.f32 %v2777_v63, %v1641_v16 }
0x1503   :  { %1645 = vrot.lane.b32.xlu1 %v1643_v55, %s2898_s29 }
0x1508   :  { %v1757_v54 = vpop.permute.xlu0 %1756 }
0x1509   :  { %v1759_v17 = vmul.f32 %v2779_v2, %v1757_v54 }
0x150b   :  { %1761 = vrot.lane.b32.xlu1 %v1759_v17, %s2898_s29 }
0x150f   :  { %1650 = vrot.lane.b32.xlu1 %v1637_v10, %s2899_s30 }
0x1513   :  { %1766 = vrot.lane.b32.xlu1 %v1753_v57, %s2899_s30 }
0x1575   :  { %v1646_v12 = vpop.permute.xlu1 %1645 }
0x1576   :  { %1648 = vst.msk [vmem:[#allocation5] sm:$0xff] %vm89_vm0, %v1646_v12 }
0x157d   :  { %v1762_v18 = vpop.permute.xlu1 %1761  ;;  %v1770_v19 = vld [vmem:[#allocation5] sm:$0xff] }
0x157e   :  { %1764 = vst.msk [vmem:[#allocation3] sm:$0xff] %vm89_vm0, %v1762_v18  ;;  %1772 = vrot.lane.b32.xlu0 %v1770_v19, %s2898_s29 }
0x1581   :  { %v1651_v20 = vpop.permute.xlu1 %1650 }
0x1582   :  { %1653 = vst.msk [vmem:[#allocation6] sm:$0xff] %vm89_vm0, %v1651_v20 }
0x1585   :  { %v1767_v21 = vpop.permute.xlu1 %1766  ;;  %v1890_v22 = vld [vmem:[#allocation3] sm:$0xff] }
0x1586   :  { %1769 = vst.msk [vmem:[#allocation4] sm:$0xff] %vm89_vm0, %v1767_v21  ;;  %2638 = vmatmul.mubr.msk.f32.vlgmr.msra.gmra.mxu1 %vm89_vm0, %v1890_v22  ;;  %v2126_v22 = vld [vmem:[%s3509_s6 + $0x18] sm:$0xff] }
0x1587   :  { %2641 = vmatpush3.msra.mxu1 %v3345_v32  ;;  %2656 = vmatprep.mubr.msk.f32.mxu1 %vm2896_vm1, %v2895_v0 }
0x1588   :  { %2642 = vmatprep.subr.mxu1 %v2895_v0 }
0x1589   :  { %2643 = vmatpush3.msra.mxu1 %v3351_v33 }
0x158a   :  { %2644 = vmatprep.subr.mxu1 %v2895_v0 }
0x158b   :  { %2645 = vmatpush3.msra.mxu1 %v3355_v35 }
0x158c   :  { %2646 = vmatprep.subr.mxu1 %v2895_v0 }
0x158d   :  { %2647 = vmatpush3.msra.mxu1 %v3359_v37  ;;  %v1849_v37 = vld [vmem:[#allocation6] sm:$0xff]  ;;  %v1965_v45 = vld [vmem:[#allocation4] sm:$0xff] }
0x158e   :  { %2648 = vmatprep.subr.mxu1 %v2895_v0 }
0x158f   :  { %2649 = vmatpush3.msra.mxu1 %v3363_v38 }
0x1590   :  { %2650 = vmatprep.subr.mxu1 %v2895_v0 }
0x1591   :  { %2651 = vmatpush3.msra.mxu1 %v3367_v40 }
0x1592   :  { %2652 = vmatprep.subr.mxu1 %v2895_v0 }
0x1593   :  { %2653 = vmatpush3.msra.mxu1 %v3371_v41 }
0x1594   :  { %2654 = vmatprep.subr.mxu1 %v2895_v0 }
0x1595   :  { %2655 = vmatpush3.msra.mxu1 %v3375_v43 }
0x15f0   :  { %v1773_v23 = vpop.permute.xlu0 %1772 }
0x15f1   :  { %v1775_v24 = vsel %vm89_vm0, %v1762_v18, %v1773_v23  ;;  %v2125_v23 = vld [vmem:[%s3509_s6 + $0x10] sm:$0xff] }
0x15f2   :  { %2627 = vmatmul.mubr.msk.f32.vlgmr.msra.gmra.mxu0 %vm371_vm2, %v1775_v24  ;;  %v2124_v24 = vld [vmem:[%s3509_s6 + $0x8] sm:$0xff] }
0x15f3   :  { %2667 = vmatprep.mubr.msk.f32.mxu0 %vm2896_vm1, %v2895_v0  ;;  %2660 = vmatpush3.msra.mxu0 %v2126_v22 }
0x15f4   :  { %2661 = vmatprep.subr.mxu0 %v2895_v0 }
0x15f5   :  { %2662 = vmatpush3.msra.mxu0 %v2125_v23 }
0x15f6   :  { %2663 = vmatprep.subr.mxu0 %v2895_v0 }
0x15f7   :  { %2664 = vmatpush3.msra.mxu0 %v2124_v24 }
0x15f8   :  { %2665 = vmatprep.subr.mxu0 %v2895_v0 }
0x1646   :  { %v1960_v26 = vpop.f32.mrf.mxu1 }
0x1647   :  { %v1964_v27 = vadd.f32 %v1960_v26, %v216_v25  ;;  %v2123_v25 = vld [vmem:[%s3509_s6] sm:$0xff] }
0x1648   :  { %v2639_v28 = vpop.f32.mrf.mxu1  ;;  %2666 = vmatpush3.msra.mxu0 %v2123_v25 }
0x1649   :  { %v2265_v40 = vmul.f32 -1.442695, %v1964_v27 }
0x16b2   :  { %v1845_v29 = vpop.f32.mrf.mxu0 }
0x16b3   :  { %v1846_v32 = vadd.f32 %v3443_v30, %v1845_v29 }
0x16b4   :  { %v2628_v33 = vpop.f32.mrf.mxu0 }
0x16b5   :  { %2784 = vtanh.f32 %v1846_v32  ;;  %v2263_v38 = vmul.f32 -1.442695, %v1846_v32 }
0x16b6   :  { %2786 = vtanh.f32 %v1964_v27 }
0x16b7   :  { %2788 = vpow2.f32 %v2263_v38 }
0x16b8   :  { %2790 = vpow2.f32 %v2265_v40 }
0x16c2   :  { %v2785_v35 = vpop.eup %2784 }
0x16c3   :  { %1863 = vrot.lane.b32.xlu0 %v2785_v35, %s2897_s28  ;;  %v2787_v58 = vpop.eup %2786 }
0x16c4   :  { %v2789_v41 = vpop.eup %2788 }
0x16c5   :  { %v1853_v43 = vadd.f32 1.0, %v2789_v41  ;;  %v2791_v47 = vpop.eup %2790 }
0x16c6   :  { %v1969_v48 = vadd.f32 1.0, %v2791_v47 }
0x16c7   :  { %1858 = vrot.lane.b32.xlu0 %v1849_v37, %s2898_s29  ;;  %2792 = vrcp.f32 %v1853_v43 }
0x16c8   :  { %2794 = vrcp.f32 %v1969_v48 }
0x16cb   :  { %1979 = vrot.lane.b32.xlu0 %v2787_v58, %s2897_s28 }
0x16d4   :  { %v2793_v49 = vpop.eup %2792 }
0x16d5   :  { %v2795_v39 = vpop.eup %2794 }
0x1735   :  { %v1864_v31 = vpop.permute.xlu0 %1863 }
0x1736   :  { %v1866_v34 = vmul.f32 %v2793_v49, %v1864_v31 }
0x1738   :  { %1868 = vrot.lane.b32.xlu1 %v1866_v34, %s2898_s29 }
0x1739   :  { %v1859_v36 = vpop.permute.xlu0 %1858 }
0x173a   :  { %v1861_v44 = vmul.f32 %v2793_v49, %v1859_v36 }
0x173c   :  { %1974 = vrot.lane.b32.xlu1 %v1965_v45, %s2898_s29 }
0x173d   :  { %v1980_v42 = vpop.permute.xlu0 %1979 }
0x173e   :  { %v1982_v46 = vmul.f32 %v2795_v39, %v1980_v42 }
0x1740   :  { %1984 = vrot.lane.b32.xlu0 %v1982_v46, %s2898_s29 }
0x17aa   :  { %v1869_v50 = vpop.permute.xlu1 %1868 }
0x17ab   :  { %v1871_v51 = vadd.f32 %v1869_v50, %v1861_v44 }
0x17ad   :  { %2796 = vtanh.f32 %v1871_v51 }
0x17ae   :  { %v1975_v60 = vpop.permute.xlu1 %1974 }
0x17af   :  { %v1977_v52 = vmul.f32 %v2795_v39, %v1975_v60 }
0x17b2   :  { %v1985_v53 = vpop.permute.xlu0 %1984 }
0x17b3   :  { %v3452_v61 = vadd.f32 %v1985_v53, %v1977_v52 }
0x17b5   :  { %2798 = vtanh.f32 %v3452_v61 }
0x17ba   :  { %v2797_v62 = vpop.eup %2796 }
0x17bb   :  { %1874 = vrot.lane.b32.xlu1 %v2797_v62, %s2897_s28 }
0x17c2   :  { %v2799_v59 = vpop.eup %2798 }
0x17c3   :  { %1990 = vrot.lane.b32.xlu1 %v2799_v59, %s2897_s28 }
0x182d   :  { %v1875_v63 = vpop.permute.xlu1 %1874 }
0x182e   :  { %v1877_v3 = vmul.f32 %v2793_v49, %v1875_v63 }
0x1830   :  { %1879 = vrot.lane.b32.xlu0 %v1877_v3, %s2898_s29 }
0x1835   :  { %v1991_v1 = vpop.permute.xlu1 %1990 }
0x1836   :  { %v1993_v14 = vmul.f32 %v2795_v39, %v1991_v1 }
0x1838   :  { %1995 = vrot.lane.b32.xlu0 %v1993_v14, %s2898_s29 }
0x183c   :  { %1884 = vrot.lane.b32.xlu0 %v1871_v51, %s2899_s30 }
0x18a2   :  { %v1880_v56 = vpop.permute.xlu0 %1879 }
0x18a3   :  { %1882 = vst.msk [vmem:[#allocation5] sm:$0xff] %vm89_vm0, %v1880_v56 }
0x18aa   :  { %v1996_v2 = vpop.permute.xlu0 %1995  ;;  %v2004_v5 = vld [vmem:[#allocation5] sm:$0xff] }
0x18ab   :  { %1998 = vst.msk [vmem:[#allocation3] sm:$0xff] %vm89_vm0, %v1996_v2  ;;  %2006 = vrot.lane.b32.xlu1 %v2004_v5, %s2898_s29 }
0x18ae   :  { %v1885_v6 = vpop.permute.xlu0 %1884 }
0x18af   :  { %1887 = vst.msk [vmem:[#allocation6] sm:$0xff] %vm89_vm0, %v1885_v6 }
0x18b6   :  { %v2083_v8 = vld [vmem:[#allocation6] sm:$0xff] }
0x18b7   :  { %2092 = vrot.lane.b32.xlu0 %v2083_v8, %s2898_s29 }
0x191d   :  { %v2007_v4 = vpop.permute.xlu1 %2006 }
0x191e   :  { %v2009_v10 = vsel %vm89_vm0, %v1996_v2, %v2007_v4 }
0x191f   :  { %2657 = vmatmul.mubr.msk.f32.vlgmr.msra.gmra.mxu1 %vm371_vm2, %v2009_v10 }
0x1929   :  { %v2093_v12 = vpop.permute.xlu0 %2092 }
0x19df   :  { %v2079_v7 = vpop.f32.mrf.mxu1 }
0x19e0   :  { %v2080_v9 = vadd.f32 %v3443_v30, %v2079_v7  ;;  %v2268_v30 = vld [vmem:[%s3510_s7] ss:$0 sm:$0xff] }
0x19e1   :  { %v2658_v11 = vpop.f32.mrf.mxu1 }
0x19e2   :  { %2800 = vtanh.f32 %v2080_v9  ;;  %v2267_v13 = vmul.f32 -1.442695, %v2080_v9 }
0x19e4   :  { %2802 = vpow2.f32 %v2267_v13 }
0x19ef   :  { %v2801_v57 = vpop.eup %2800 }
0x19f0   :  { %2097 = vrot.lane.b32.xlu1 %v2801_v57, %s2897_s28 }
0x19f1   :  { %v2803_v15 = vpop.eup %2802 }
0x19f2   :  { %v2087_v16 = vadd.f32 1.0, %v2803_v15 }
0x19f4   :  { %2804 = vrcp.f32 %v2087_v16 }
0x1a01   :  { %v2805_v55 = vpop.eup %2804 }
0x1a02   :  { %v2095_v18 = vmul.f32 %v2805_v55, %v2093_v12 }
0x1a62   :  { %v2098_v54 = vpop.permute.xlu1 %2097 }
0x1a63   :  { %v2100_v17 = vmul.f32 %v2805_v55, %v2098_v54 }
0x1a65   :  { %2102 = vrot.lane.b32.xlu1 %v2100_v17, %s2898_s29 }
0x1ad7   :  { %v2103_v19 = vpop.permute.xlu1 %2102 }
0x1ad8   :  { %v2105_v20 = vadd.f32 %v2103_v19, %v2095_v18 }
0x1ada   :  { %2806 = vtanh.f32 %v2105_v20 }
0x1ae7   :  { %v2807_v21 = vpop.eup %2806 }
0x1ae8   :  { %2108 = vrot.lane.b32.xlu0 %v2807_v21, %s2897_s28 }
0x1b5a   :  { %v2109_v26 = vpop.permute.xlu0 %2108 }
0x1b5b   :  { %v2111_v27 = vmul.f32 %v2805_v55, %v2109_v26 }
0x1b5d   :  { %2113 = vrot.lane.b32.xlu1 %v2111_v27, %s2898_s29 }
0x1bcf   :  { %v2114_v28 = vpop.permute.xlu1 %2113 }
0x1bd0   :  { %2116 = vst.msk [vmem:[#allocation5] sm:$0xff] %vm89_vm0, %v2114_v28 }
0x1bd7   :  { %v2122_v29 = vld [vmem:[#allocation5] sm:$0xff] }
0x1bd8   :  { %2668 = vmatmul.mubr.msk.f32.vlgmr.msra.gmra.mxu0 %vm89_vm0, %v2122_v29 }
0x1c98   :  { %v2203_v32 = vpop.f32.mrf.mxu0 }
0x1c99   :  { %v2204_v33 = vadd.f32 %v2268_v30, %v2203_v32 }
0x1c9a   :  { %v2669_v35 = vpop.f32.mrf.mxu0 }
0x1c9b   :  { %v2208_v0 = vsel %vm2207_vm3, %v2204_v33, -inf }
0x1c9c   :  { %2209 = vmax.xlane.f32.xlu0 %v2208_v0 }
0x1cb2   :  { %2000 = vrot.lane.b32.xlu0 %v3452_v61, %s2899_s30 }
0x1d25   :  { %v2210_v37 = vpop.xlane.xlu0 %2209 }
0x1d26   :  { %v2211_v58 = vsub.f32 %v2204_v33, %v2210_v37 }
0x1d28   :  { %v2212_v38 = vmul.f32 1.442695, %v2211_v58 }
0x1d29   :  { %v2001_v40 = vpop.permute.xlu0 %2000 }
0x1d2a   :  { %2808 = vpow2.f32 %v2212_v38  ;;  %2003 = vst.msk [vmem:[#allocation4] sm:$0xff] %vm89_vm0, %v2001_v40 }
0x1d37   :  { %v2809_v41 = vpop.eup %2808 }
0x1d38   :  { %v2214_v43 = vsel %vm2207_vm3, %v2809_v41, 0.0 }
0x1d39   :  { %2215 = vadd.xlane.f32.xlu1 %v2214_v43 }
0x1d4a   :  { %2118 = vrot.lane.b32.xlu1 %v2105_v20, %s2899_s30 }
0x1dc2   :  { %v2216_v47 = vpop.xlane.xlu1 %2215 }
0x1dc3   :  { %2810 = vrcp.f32 %v2216_v47 }
0x1dc6   :  { %v2119_v48 = vpop.permute.xlu1 %2118 }
0x1dc7   :  { %2121 = vst.msk [vmem:[#allocation6] sm:$0xff] %vm89_vm0, %v2119_v48 }
0x1dd0   :  { %v2811_v49 = vpop.eup %2810 }
0x1dd1   :  { %v2218_v31 = vmul.f32 %v2811_v49, %v2809_v41 }
0x1dd3   :  { %2219 = vst.msk [vmem:[%s3511_s8] sm:$0xff] %vm2207_vm3, %v2218_v31 }
0x1dd4   :  { %2224 = vsyncpa [#allocation8], 1 }
0x1dd5   :  { %2225 = vsyncpa [#allocation10], 1 }

</bundles_post_ra>
